<compile_context>
chip_gen: v7x
topology: tpu7x:2x2x1
jax: 0.10.0
libtpu: 0.0.40
codegen_flags: <defaults>
</compile_context>

<pallas_src>
import functools
import math

import jax
import jax.numpy as jnp
from jax.experimental import pallas as pl
from jax.experimental.pallas import tpu as pltpu

LN_EPS = 1e-5
NT_DIMS = (((1,), (1,)), ((), ()))   # contract last dims of both operands: q @ k^T


def _layernorm(h, gamma, beta):
    mu = jnp.mean(h, axis=-1, keepdims=True)
    var = jnp.mean((h - mu) ** 2, axis=-1, keepdims=True)
    return (h - mu) * jax.lax.rsqrt(var + LN_EPS) * gamma + beta


def _gelu_exact(x):
    # PyTorch nn.GELU() default: exact erf formulation (kept in float32).
    return 0.5 * x * (1.0 + jax.lax.erf(x * (1.0 / math.sqrt(2.0))))


def transformer_layer_kernel(
    x_ref,
    g1_ref, bt1_ref,
    wqkv_ref, bqkv_ref, wo_ref, bo_ref,
    g2_ref, bt2_ref,
    w1_ref, bf1_ref, w2_ref, bf2_ref,
    out_ref,
    attn_sc,
    *, seq_len, block_b, nhead, d_attention,
):
    S, H, dk = seq_len, nhead, d_attention
    Hdk = H * dk
    x = x_ref[...]                                   # (block_b*S, D) float32

    # ---- pre-norm 1 (f32 elementwise) ----
    xn = _layernorm(x, g1_ref[...], bt1_ref[...])

    # ---- fused QKV projection: one wide bf16 matmul, f32 accumulation ----
    qkv = jnp.dot(xn.astype(jnp.bfloat16), wqkv_ref[...],
                  preferred_element_type=jnp.float32) + bqkv_ref[...]   # (R, 3*Hdk) f32

    scale = 1.0 / math.sqrt(dk)
    # static loops over (sequence-in-block, head); all slice offsets are compile-time ints
    for b in range(block_b):
        r0 = b * S
        for h in range(H):
            q = qkv[r0:r0 + S, h * dk:(h + 1) * dk] * scale
            k = qkv[r0:r0 + S, Hdk + h * dk: Hdk + (h + 1) * dk]
            v = qkv[r0:r0 + S, 2 * Hdk + h * dk: 2 * Hdk + (h + 1) * dk]
            # scores = q @ k^T without materializing a transpose (NT dot_general)
            s = jax.lax.dot_general(q.astype(jnp.bfloat16), k.astype(jnp.bfloat16),
                                    NT_DIMS, preferred_element_type=jnp.float32)
            s = s - jnp.max(s, axis=-1, keepdims=True)
            p = jnp.exp(s)                                   # unnormalized probabilities
            denom = jnp.sum(p, axis=-1, keepdims=True)
            o = jnp.dot(p.astype(jnp.bfloat16), v.astype(jnp.bfloat16),
                        preferred_element_type=jnp.float32)  # (S, dk) f32
            # normalize after PV: divides S*dk elements instead of S*S, via EUP reciprocal
            o = o * pl.reciprocal(denom, approx=True)
            attn_sc[r0:r0 + S, h * dk:(h + 1) * dk] = o.astype(jnp.bfloat16)

    # ---- output projection + residual 1 (dropout1 = identity) ----
    attn = jnp.dot(attn_sc[...], wo_ref[...],
                   preferred_element_type=jnp.float32) + bo_ref[...]
    src2 = x + attn

    # ---- pre-norm 2 + feed-forward ----
    s3 = _layernorm(src2, g2_ref[...], bt2_ref[...])
    h1 = jnp.dot(s3.astype(jnp.bfloat16), w1_ref[...],
                 preferred_element_type=jnp.float32) + bf1_ref[...]
    h1 = _gelu_exact(h1)
    h2 = jnp.dot(h1.astype(jnp.bfloat16), w2_ref[...],
                 preferred_element_type=jnp.float32) + bf2_ref[...]

    # ---- residual 2 (dropout / dropout2 = identity) ----
    out_ref[...] = h2 + src2


def transformer_layer(src, params, *, nhead, d_attention, block_b=None):
    B, S, D = src.shape
    H, dk = nhead, d_attention
    Hdk = H * dk
    dff = params["w1"].shape[1]

    if block_b is None:
        # several whole sequences per grid step so the MXU sees a reasonable M
        block_b = max(1, min(B, 256 // max(S, 1)))
    while B % block_b:
        block_b -= 1
    R = block_b * S

    bf16 = jnp.bfloat16
    # Fused QKV weight / bias (bias kept f32; matmul weights in bf16).
    wqkv = jnp.concatenate([params["wq"], params["wk"], params["wv"]], axis=1).astype(bf16)
    bqkv = jnp.concatenate([params["bq"], params["bk"], params["bv"]], axis=1)
    args = [
        params["g1"], params["bt1"],
        wqkv, bqkv, params["wo"].astype(bf16), params["bo"],
        params["g2"], params["bt2"],
        params["w1"].astype(bf16), params["bf1"],
        params["w2"].astype(bf16), params["bf2"],
    ]

    def _full_spec(arr):
        nd = arr.ndim
        return pl.BlockSpec(arr.shape, lambda i, _nd=nd: (0,) * _nd)

    x2 = src.reshape(B * S, D)
    in_specs = [pl.BlockSpec((R, D), lambda i: (i, 0))] + [_full_spec(a) for a in args]

    kernel = functools.partial(
        transformer_layer_kernel,
        seq_len=S, block_b=block_b, nhead=H, d_attention=dk,
    )

    flops = 2 * B * S * (3 * D * Hdk + 2 * S * Hdk + Hdk * D + 2 * D * dff)
    transcendentals = B * S * (H * S + dff)
    bytes_accessed = (2 * B * S * D * 4
                      + sum(int(a.size) * a.dtype.itemsize for a in args))

    out2 = pl.pallas_call(
        kernel,
        out_shape=jax.ShapeDtypeStruct((B * S, D), jnp.float32),
        grid_spec=pltpu.PrefetchScalarGridSpec(
            num_scalar_prefetch=0,
            grid=(B // block_b,),
            in_specs=in_specs,
            out_specs=pl.BlockSpec((R, D), lambda i: (i, 0)),
            scratch_shapes=[pltpu.VMEM((R, Hdk), jnp.bfloat16)],
        ),
        compiler_params=pltpu.CompilerParams(
            dimension_semantics=("parallel",),
        ),
        cost_estimate=pl.CostEstimate(
            flops=flops, transcendentals=transcendentals,
            bytes_accessed=bytes_accessed),
    )(x2, *args)
    return out2.reshape(B, S, D)


# --------------------------- reference (plain JAX, f32) ---------------------------
def transformer_layer_ref(src, p, *, nhead, d_attention):
    xn = _layernorm(src, p["g1"], p["bt1"])
    q = xn @ p["wq"] + p["bq"]
    k = xn @ p["wk"] + p["bk"]
    v = xn @ p["wv"] + p["bv"]
    B, S, _ = src.shape
    q = q.reshape(B, S, nhead, d_attention).transpose(0, 2, 1, 3)
    k = k.reshape(B, S, nhead, d_attention).transpose(0, 2, 1, 3)
    v = v.reshape(B, S, nhead, d_attention).transpose(0, 2, 1, 3)
    s = jnp.einsum("bhqd,bhkd->bhqk", q, k) / math.sqrt(d_attention)
    a = jax.nn.softmax(s, axis=-1)
    o = jnp.einsum("bhqk,bhkd->bhqd", a, v).transpose(0, 2, 1, 3).reshape(B, S, -1)
    attn = o @ p["wo"] + p["bo"]
    src2 = src + attn
    s3 = _layernorm(src2, p["g2"], p["bt2"])
    h = _gelu_exact(s3 @ p["w1"] + p["bf1"]) @ p["w2"] + p["bf2"]
    return h + src2


# ------------------------------ parameter init ------------------------------
def init_params(key, d_model, d_attention, nhead, dim_feedforward):
    d_attn_total = nhead * d_attention

    def xavier(k, shape):  # shape = (fan_in, fan_out); stored as (in, out) == W.T
        fan_in, fan_out = shape
        lim = math.sqrt(6.0 / (fan_in + fan_out))
        return jax.random.uniform(k, shape, jnp.float32, -lim, lim)

    def bias(k, fan_in, n):  # PyTorch Linear default bias init
        lim = 1.0 / math.sqrt(fan_in)
        return jax.random.uniform(k, (1, n), jnp.float32, -lim, lim)

    ks = jax.random.split(key, 12)
    params = {
        "g1": jnp.ones((1, d_model), jnp.float32),
        "bt1": jnp.zeros((1, d_model), jnp.float32),
        "wq": xavier(ks[0], (d_model, d_attn_total)),
        "bq": bias(ks[1], d_model, d_attn_total),
        "wk": xavier(ks[2], (d_model, d_attn_total)),
        "bk": bias(ks[3], d_model, d_attn_total),
        "wv": xavier(ks[4], (d_model, d_attn_total)),
        "bv": bias(ks[5], d_model, d_attn_total),
        "wo": xavier(ks[6], (d_attn_total, d_model)),
        "bo": bias(ks[7], d_attn_total, d_model),
        "g2": jnp.ones((1, d_model), jnp.float32),
        "bt2": jnp.zeros((1, d_model), jnp.float32),
        "w1": xavier(ks[8], (d_model, dim_feedforward)),
        "bf1": bias(ks[9], d_model, dim_feedforward),
        "w2": xavier(ks[10], (dim_feedforward, d_model)),
        "bf2": bias(ks[11], dim_feedforward, d_model),
    }
    return params


if __name__ == "__main__":
    B, S = 2, 8
    d_model, d_attention, nhead, dim_feedforward = 32, 8, 4, 64

    key = jax.random.PRNGKey(0)
    k_x, k_p = jax.random.split(key)
    src = jax.random.normal(k_x, (B, S, d_model), jnp.float32)
    params = init_params(k_p, d_model, d_attention, nhead, dim_feedforward)

    out = transformer_layer(src, params, nhead=nhead, d_attention=d_attention)
    out = jax.block_until_ready(out)

    ref = transformer_layer_ref(src, params, nhead=nhead, d_attention=d_attention)
    assert out.shape == (B, S, d_model)
    # bf16 matmul inputs (f32 accumulation) -> relaxed tolerance vs the pure-f32 reference
    assert jnp.allclose(out, ref, atol=3e-1, rtol=3e-2), float(jnp.max(jnp.abs(out - ref)))

    print("KERNEL_OK")
</pallas_src>

<mosaic_0001>
module attributes {stable_mosaic.version = 11 : i64} {
  func.func @transformer_layer_kernel(%arg0: i32, %arg1: memref<16x32xf32, #tpu.memory_space<vmem>>, %arg2: memref<1x32xf32, #tpu.memory_space<vmem>>, %arg3: memref<1x32xf32, #tpu.memory_space<vmem>>, %arg4: memref<32x96xbf16, #tpu.memory_space<vmem>>, %arg5: memref<1x96xf32, #tpu.memory_space<vmem>>, %arg6: memref<32x32xbf16, #tpu.memory_space<vmem>>, %arg7: memref<1x32xf32, #tpu.memory_space<vmem>>, %arg8: memref<1x32xf32, #tpu.memory_space<vmem>>, %arg9: memref<1x32xf32, #tpu.memory_space<vmem>>, %arg10: memref<32x64xbf16, #tpu.memory_space<vmem>>, %arg11: memref<1x64xf32, #tpu.memory_space<vmem>>, %arg12: memref<64x32xbf16, #tpu.memory_space<vmem>>, %arg13: memref<1x32xf32, #tpu.memory_space<vmem>>, %arg14: memref<16x32xf32, #tpu.memory_space<vmem>>, %arg15: memref<16x32xbf16, #tpu.memory_space<vmem>>) attributes {dimension_semantics = [#tpu.dimension_semantics<parallel>], iteration_bounds = array<i64: 1>, scalar_prefetch = 0 : i64, scratch_operands = 1 : i64, tpu.core_type = #tpu.core_type<tc>, window_params = [{transform_indices = @transform_0, window_bounds = array<i64: 16, 32>}, {pipeline_mode = #tpu.pipeline_mode<synchronous>, transform_indices = @transform_1, window_bounds = array<i64: 1, 32>}, {pipeline_mode = #tpu.pipeline_mode<synchronous>, transform_indices = @transform_2, window_bounds = array<i64: 1, 32>}, {pipeline_mode = #tpu.pipeline_mode<synchronous>, transform_indices = @transform_3, window_bounds = array<i64: 32, 96>}, {pipeline_mode = #tpu.pipeline_mode<synchronous>, transform_indices = @transform_4, window_bounds = array<i64: 1, 96>}, {pipeline_mode = #tpu.pipeline_mode<synchronous>, transform_indices = @transform_5, window_bounds = array<i64: 32, 32>}, {pipeline_mode = #tpu.pipeline_mode<synchronous>, transform_indices = @transform_6, window_bounds = array<i64: 1, 32>}, {pipeline_mode = #tpu.pipeline_mode<synchronous>, transform_indices = @transform_7, window_bounds = array<i64: 1, 32>}, {pipeline_mode = #tpu.pipeline_mode<synchronous>, transform_indices = @transform_8, window_bounds = array<i64: 1, 32>}, {pipeline_mode = #tpu.pipeline_mode<synchronous>, transform_indices = @transform_9, window_bounds = array<i64: 32, 64>}, {pipeline_mode = #tpu.pipeline_mode<synchronous>, transform_indices = @transform_10, window_bounds = array<i64: 1, 64>}, {pipeline_mode = #tpu.pipeline_mode<synchronous>, transform_indices = @transform_11, window_bounds = array<i64: 64, 32>}, {pipeline_mode = #tpu.pipeline_mode<synchronous>, transform_indices = @transform_12, window_bounds = array<i64: 1, 32>}, {transform_indices = @transform_13, window_bounds = array<i64: 16, 32>}]} {
    %c0 = arith.constant 0 : index
    %c0_0 = arith.constant 0 : index
    %0 = vector.load %arg1[%c0, %c0_0] : memref<16x32xf32, #tpu.memory_space<vmem>>, vector<16x32xf32>
    %c0_1 = arith.constant 0 : index
    %c0_2 = arith.constant 0 : index
    %1 = vector.load %arg2[%c0_1, %c0_2] : memref<1x32xf32, #tpu.memory_space<vmem>>, vector<1x32xf32>
    %c0_3 = arith.constant 0 : index
    %c0_4 = arith.constant 0 : index
    %2 = vector.load %arg3[%c0_3, %c0_4] : memref<1x32xf32, #tpu.memory_space<vmem>>, vector<1x32xf32>
    %cst = arith.constant dense<0.000000e+00> : vector<16xf32>
    %3 = vector.multi_reduction <add>, %0, %cst [1] : vector<16x32xf32> to vector<16xf32>
    %4 = vector.shape_cast %3 : vector<16xf32> to vector<16x1xf32>
    %cst_5 = arith.constant 3.200000e+01 : f32
    %5 = vector.broadcast %cst_5 : f32 to vector<16x1xf32>
    %6 = arith.divf %4, %5 : vector<16x1xf32>
    %7 = vector.broadcast %6 : vector<16x1xf32> to vector<16x32xf32>
    %8 = arith.subf %0, %7 : vector<16x32xf32>
    %9 = arith.mulf %8, %8 : vector<16x32xf32>
    %cst_6 = arith.constant dense<0.000000e+00> : vector<16xf32>
    %10 = vector.multi_reduction <add>, %9, %cst_6 [1] : vector<16x32xf32> to vector<16xf32>
    %11 = vector.shape_cast %10 : vector<16xf32> to vector<16x1xf32>
    %cst_7 = arith.constant 3.200000e+01 : f32
    %12 = vector.broadcast %cst_7 : f32 to vector<16x1xf32>
    %13 = arith.divf %11, %12 : vector<16x1xf32>
    %14 = vector.broadcast %6 : vector<16x1xf32> to vector<16x32xf32>
    %15 = arith.subf %0, %14 : vector<16x32xf32>
    %cst_8 = arith.constant 9.99999974E-6 : f32
    %16 = vector.broadcast %cst_8 : f32 to vector<16x1xf32>
    %17 = arith.addf %13, %16 : vector<16x1xf32>
    %18 = math.rsqrt %17 : vector<16x1xf32>
    %19 = vector.broadcast %18 : vector<16x1xf32> to vector<16x32xf32>
    %20 = arith.mulf %15, %19 : vector<16x32xf32>
    %21 = vector.broadcast %1 : vector<1x32xf32> to vector<16x32xf32>
    %22 = arith.mulf %20, %21 : vector<16x32xf32>
    %23 = vector.broadcast %2 : vector<1x32xf32> to vector<16x32xf32>
    %24 = arith.addf %22, %23 : vector<16x32xf32>
    %25 = arith.truncf %24 : vector<16x32xf32> to vector<16x32xbf16>
    %c0_9 = arith.constant 0 : index
    %c0_10 = arith.constant 0 : index
    %26 = vector.load %arg4[%c0_9, %c0_10] : memref<32x96xbf16, #tpu.memory_space<vmem>>, vector<32x96xbf16>
    %cst_11 = arith.constant dense<0.000000e+00> : vector<16x96xf32>
    %27 = tpu.matmul %25, %26, %cst_11 {dimension_numbers = #tpu.dot_dimension_numbers<[1], [0], [0], [1], [0, 0, 1, 1], [], []>} : vector<16x32xbf16>, vector<32x96xbf16>, vector<16x96xf32> -> vector<16x96xf32>
    %c0_12 = arith.constant 0 : index
    %c0_13 = arith.constant 0 : index
    %28 = vector.load %arg5[%c0_12, %c0_13] : memref<1x96xf32, #tpu.memory_space<vmem>>, vector<1x96xf32>
    %29 = vector.broadcast %28 : vector<1x96xf32> to vector<16x96xf32>
    %30 = arith.addf %27, %29 : vector<16x96xf32>
    %31 = vector.extract_strided_slice %30 {offsets = [0, 0], sizes = [8, 8], strides = [1, 1]} : vector<16x96xf32> to vector<8x8xf32>
    %cst_14 = arith.constant 0.353553385 : f32
    %32 = vector.broadcast %cst_14 : f32 to vector<8x8xf32>
    %33 = arith.mulf %31, %32 : vector<8x8xf32>
    %34 = vector.extract_strided_slice %30 {offsets = [0, 32], sizes = [8, 8], strides = [1, 1]} : vector<16x96xf32> to vector<8x8xf32>
    %35 = vector.extract_strided_slice %30 {offsets = [0, 64], sizes = [8, 8], strides = [1, 1]} : vector<16x96xf32> to vector<8x8xf32>
    %36 = arith.truncf %33 : vector<8x8xf32> to vector<8x8xbf16>
    %37 = arith.truncf %34 : vector<8x8xf32> to vector<8x8xbf16>
    %cst_15 = arith.constant dense<0.000000e+00> : vector<8x8xf32>
    %38 = tpu.matmul %36, %37, %cst_15 {dimension_numbers = #tpu.dot_dimension_numbers<[1], [1], [0], [0], [0, 0, 1, 0], [], []>} : vector<8x8xbf16>, vector<8x8xbf16>, vector<8x8xf32> -> vector<8x8xf32>
    %cst_16 = arith.constant dense<0xFF800000> : vector<8xf32>
    %39 = vector.multi_reduction <maximumf>, %38, %cst_16 [1] : vector<8x8xf32> to vector<8xf32>
    %40 = vector.shape_cast %39 : vector<8xf32> to vector<8x1xf32>
    %41 = vector.broadcast %40 : vector<8x1xf32> to vector<8x8xf32>
    %42 = arith.subf %38, %41 : vector<8x8xf32>
    %43 = math.exp %42 : vector<8x8xf32>
    %cst_17 = arith.constant dense<0.000000e+00> : vector<8xf32>
    %44 = vector.multi_reduction <add>, %43, %cst_17 [1] : vector<8x8xf32> to vector<8xf32>
    %45 = vector.shape_cast %44 : vector<8xf32> to vector<8x1xf32>
    %46 = arith.truncf %43 : vector<8x8xf32> to vector<8x8xbf16>
    %47 = arith.truncf %35 : vector<8x8xf32> to vector<8x8xbf16>
    %cst_18 = arith.constant dense<0.000000e+00> : vector<8x8xf32>
    %48 = tpu.matmul %46, %47, %cst_18 {dimension_numbers = #tpu.dot_dimension_numbers<[1], [0], [0], [1], [0, 0, 1, 1], [], []>} : vector<8x8xbf16>, vector<8x8xbf16>, vector<8x8xf32> -> vector<8x8xf32>
    %49 = tpu.reciprocal %45 {approx = true} : vector<8x1xf32> -> vector<8x1xf32>
    %50 = vector.broadcast %49 : vector<8x1xf32> to vector<8x8xf32>
    %51 = arith.mulf %48, %50 : vector<8x8xf32>
    %52 = arith.truncf %51 : vector<8x8xf32> to vector<8x8xbf16>
    %c0_19 = arith.constant 0 : index
    %c0_20 = arith.constant 0 : index
    %53 = vector.load %arg15[%c0_19, %c0_20] : memref<16x32xbf16, #tpu.memory_space<vmem>>, vector<8x8xbf16>
    tpu.vector_store %arg15[%c0_19, %c0_20], %52 {strides = array<i32>} : memref<16x32xbf16, #tpu.memory_space<vmem>>, vector<8x8xbf16>,
    %54 = vector.extract_strided_slice %30 {offsets = [0, 8], sizes = [8, 8], strides = [1, 1]} : vector<16x96xf32> to vector<8x8xf32>
    %cst_21 = arith.constant 0.353553385 : f32
    %55 = vector.broadcast %cst_21 : f32 to vector<8x8xf32>
    %56 = arith.mulf %54, %55 : vector<8x8xf32>
    %57 = vector.extract_strided_slice %30 {offsets = [0, 40], sizes = [8, 8], strides = [1, 1]} : vector<16x96xf32> to vector<8x8xf32>
    %58 = vector.extract_strided_slice %30 {offsets = [0, 72], sizes = [8, 8], strides = [1, 1]} : vector<16x96xf32> to vector<8x8xf32>
    %59 = arith.truncf %56 : vector<8x8xf32> to vector<8x8xbf16>
    %60 = arith.truncf %57 : vector<8x8xf32> to vector<8x8xbf16>
    %cst_22 = arith.constant dense<0.000000e+00> : vector<8x8xf32>
    %61 = tpu.matmul %59, %60, %cst_22 {dimension_numbers = #tpu.dot_dimension_numbers<[1], [1], [0], [0], [0, 0, 1, 0], [], []>} : vector<8x8xbf16>, vector<8x8xbf16>, vector<8x8xf32> -> vector<8x8xf32>
    %cst_23 = arith.constant dense<0xFF800000> : vector<8xf32>
    %62 = vector.multi_reduction <maximumf>, %61, %cst_23 [1] : vector<8x8xf32> to vector<8xf32>
    %63 = vector.shape_cast %62 : vector<8xf32> to vector<8x1xf32>
    %64 = vector.broadcast %63 : vector<8x1xf32> to vector<8x8xf32>
    %65 = arith.subf %61, %64 : vector<8x8xf32>
    %66 = math.exp %65 : vector<8x8xf32>
    %cst_24 = arith.constant dense<0.000000e+00> : vector<8xf32>
    %67 = vector.multi_reduction <add>, %66, %cst_24 [1] : vector<8x8xf32> to vector<8xf32>
    %68 = vector.shape_cast %67 : vector<8xf32> to vector<8x1xf32>
    %69 = arith.truncf %66 : vector<8x8xf32> to vector<8x8xbf16>
    %70 = arith.truncf %58 : vector<8x8xf32> to vector<8x8xbf16>
    %cst_25 = arith.constant dense<0.000000e+00> : vector<8x8xf32>
    %71 = tpu.matmul %69, %70, %cst_25 {dimension_numbers = #tpu.dot_dimension_numbers<[1], [0], [0], [1], [0, 0, 1, 1], [], []>} : vector<8x8xbf16>, vector<8x8xbf16>, vector<8x8xf32> -> vector<8x8xf32>
    %72 = tpu.reciprocal %68 {approx = true} : vector<8x1xf32> -> vector<8x1xf32>
    %73 = vector.broadcast %72 : vector<8x1xf32> to vector<8x8xf32>
    %74 = arith.mulf %71, %73 : vector<8x8xf32>
    %75 = arith.truncf %74 : vector<8x8xf32> to vector<8x8xbf16>
    %c0_26 = arith.constant 0 : index
    %c8 = arith.constant 8 : index
    %76 = vector.load %arg15[%c0_26, %c8] : memref<16x32xbf16, #tpu.memory_space<vmem>>, vector<8x8xbf16>
    tpu.vector_store %arg15[%c0_26, %c8], %75 {strides = array<i32>} : memref<16x32xbf16, #tpu.memory_space<vmem>>, vector<8x8xbf16>,
    %77 = vector.extract_strided_slice %30 {offsets = [0, 16], sizes = [8, 8], strides = [1, 1]} : vector<16x96xf32> to vector<8x8xf32>
    %cst_27 = arith.constant 0.353553385 : f32
    %78 = vector.broadcast %cst_27 : f32 to vector<8x8xf32>
    %79 = arith.mulf %77, %78 : vector<8x8xf32>
    %80 = vector.extract_strided_slice %30 {offsets = [0, 48], sizes = [8, 8], strides = [1, 1]} : vector<16x96xf32> to vector<8x8xf32>
    %81 = vector.extract_strided_slice %30 {offsets = [0, 80], sizes = [8, 8], strides = [1, 1]} : vector<16x96xf32> to vector<8x8xf32>
    %82 = arith.truncf %79 : vector<8x8xf32> to vector<8x8xbf16>
    %83 = arith.truncf %80 : vector<8x8xf32> to vector<8x8xbf16>
    %cst_28 = arith.constant dense<0.000000e+00> : vector<8x8xf32>
    %84 = tpu.matmul %82, %83, %cst_28 {dimension_numbers = #tpu.dot_dimension_numbers<[1], [1], [0], [0], [0, 0, 1, 0], [], []>} : vector<8x8xbf16>, vector<8x8xbf16>, vector<8x8xf32> -> vector<8x8xf32>
    %cst_29 = arith.constant dense<0xFF800000> : vector<8xf32>
    %85 = vector.multi_reduction <maximumf>, %84, %cst_29 [1] : vector<8x8xf32> to vector<8xf32>
    %86 = vector.shape_cast %85 : vector<8xf32> to vector<8x1xf32>
    %87 = vector.broadcast %86 : vector<8x1xf32> to vector<8x8xf32>
    %88 = arith.subf %84, %87 : vector<8x8xf32>
    %89 = math.exp %88 : vector<8x8xf32>
    %cst_30 = arith.constant dense<0.000000e+00> : vector<8xf32>
    %90 = vector.multi_reduction <add>, %89, %cst_30 [1] : vector<8x8xf32> to vector<8xf32>
    %91 = vector.shape_cast %90 : vector<8xf32> to vector<8x1xf32>
    %92 = arith.truncf %89 : vector<8x8xf32> to vector<8x8xbf16>
    %93 = arith.truncf %81 : vector<8x8xf32> to vector<8x8xbf16>
    %cst_31 = arith.constant dense<0.000000e+00> : vector<8x8xf32>
    %94 = tpu.matmul %92, %93, %cst_31 {dimension_numbers = #tpu.dot_dimension_numbers<[1], [0], [0], [1], [0, 0, 1, 1], [], []>} : vector<8x8xbf16>, vector<8x8xbf16>, vector<8x8xf32> -> vector<8x8xf32>
    %95 = tpu.reciprocal %91 {approx = true} : vector<8x1xf32> -> vector<8x1xf32>
    %96 = vector.broadcast %95 : vector<8x1xf32> to vector<8x8xf32>
    %97 = arith.mulf %94, %96 : vector<8x8xf32>
    %98 = arith.truncf %97 : vector<8x8xf32> to vector<8x8xbf16>
    %c0_32 = arith.constant 0 : index
    %c16 = arith.constant 16 : index
    %99 = vector.load %arg15[%c0_32, %c16] : memref<16x32xbf16, #tpu.memory_space<vmem>>, vector<8x8xbf16>
    tpu.vector_store %arg15[%c0_32, %c16], %98 {strides = array<i32>} : memref<16x32xbf16, #tpu.memory_space<vmem>>, vector<8x8xbf16>,
    %100 = vector.extract_strided_slice %30 {offsets = [0, 24], sizes = [8, 8], strides = [1, 1]} : vector<16x96xf32> to vector<8x8xf32>
    %cst_33 = arith.constant 0.353553385 : f32
    %101 = vector.broadcast %cst_33 : f32 to vector<8x8xf32>
    %102 = arith.mulf %100, %101 : vector<8x8xf32>
    %103 = vector.extract_strided_slice %30 {offsets = [0, 56], sizes = [8, 8], strides = [1, 1]} : vector<16x96xf32> to vector<8x8xf32>
    %104 = vector.extract_strided_slice %30 {offsets = [0, 88], sizes = [8, 8], strides = [1, 1]} : vector<16x96xf32> to vector<8x8xf32>
    %105 = arith.truncf %102 : vector<8x8xf32> to vector<8x8xbf16>
    %106 = arith.truncf %103 : vector<8x8xf32> to vector<8x8xbf16>
    %cst_34 = arith.constant dense<0.000000e+00> : vector<8x8xf32>
    %107 = tpu.matmul %105, %106, %cst_34 {dimension_numbers = #tpu.dot_dimension_numbers<[1], [1], [0], [0], [0, 0, 1, 0], [], []>} : vector<8x8xbf16>, vector<8x8xbf16>, vector<8x8xf32> -> vector<8x8xf32>
    %cst_35 = arith.constant dense<0xFF800000> : vector<8xf32>
    %108 = vector.multi_reduction <maximumf>, %107, %cst_35 [1] : vector<8x8xf32> to vector<8xf32>
    %109 = vector.shape_cast %108 : vector<8xf32> to vector<8x1xf32>
    %110 = vector.broadcast %109 : vector<8x1xf32> to vector<8x8xf32>
    %111 = arith.subf %107, %110 : vector<8x8xf32>
    %112 = math.exp %111 : vector<8x8xf32>
    %cst_36 = arith.constant dense<0.000000e+00> : vector<8xf32>
    %113 = vector.multi_reduction <add>, %112, %cst_36 [1] : vector<8x8xf32> to vector<8xf32>
    %114 = vector.shape_cast %113 : vector<8xf32> to vector<8x1xf32>
    %115 = arith.truncf %112 : vector<8x8xf32> to vector<8x8xbf16>
    %116 = arith.truncf %104 : vector<8x8xf32> to vector<8x8xbf16>
    %cst_37 = arith.constant dense<0.000000e+00> : vector<8x8xf32>
    %117 = tpu.matmul %115, %116, %cst_37 {dimension_numbers = #tpu.dot_dimension_numbers<[1], [0], [0], [1], [0, 0, 1, 1], [], []>} : vector<8x8xbf16>, vector<8x8xbf16>, vector<8x8xf32> -> vector<8x8xf32>
    %118 = tpu.reciprocal %114 {approx = true} : vector<8x1xf32> -> vector<8x1xf32>
    %119 = vector.broadcast %118 : vector<8x1xf32> to vector<8x8xf32>
    %120 = arith.mulf %117, %119 : vector<8x8xf32>
    %121 = arith.truncf %120 : vector<8x8xf32> to vector<8x8xbf16>
    %c0_38 = arith.constant 0 : index
    %c24 = arith.constant 24 : index
    %122 = vector.load %arg15[%c0_38, %c24] : memref<16x32xbf16, #tpu.memory_space<vmem>>, vector<8x8xbf16>
    tpu.vector_store %arg15[%c0_38, %c24], %121 {strides = array<i32>} : memref<16x32xbf16, #tpu.memory_space<vmem>>, vector<8x8xbf16>,
    %123 = vector.extract_strided_slice %30 {offsets = [8, 0], sizes = [8, 8], strides = [1, 1]} : vector<16x96xf32> to vector<8x8xf32>
    %cst_39 = arith.constant 0.353553385 : f32
    %124 = vector.broadcast %cst_39 : f32 to vector<8x8xf32>
    %125 = arith.mulf %123, %124 : vector<8x8xf32>
    %126 = vector.extract_strided_slice %30 {offsets = [8, 32], sizes = [8, 8], strides = [1, 1]} : vector<16x96xf32> to vector<8x8xf32>
    %127 = vector.extract_strided_slice %30 {offsets = [8, 64], sizes = [8, 8], strides = [1, 1]} : vector<16x96xf32> to vector<8x8xf32>
    %128 = arith.truncf %125 : vector<8x8xf32> to vector<8x8xbf16>
    %129 = arith.truncf %126 : vector<8x8xf32> to vector<8x8xbf16>
    %cst_40 = arith.constant dense<0.000000e+00> : vector<8x8xf32>
    %130 = tpu.matmul %128, %129, %cst_40 {dimension_numbers = #tpu.dot_dimension_numbers<[1], [1], [0], [0], [0, 0, 1, 0], [], []>} : vector<8x8xbf16>, vector<8x8xbf16>, vector<8x8xf32> -> vector<8x8xf32>
    %cst_41 = arith.constant dense<0xFF800000> : vector<8xf32>
    %131 = vector.multi_reduction <maximumf>, %130, %cst_41 [1] : vector<8x8xf32> to vector<8xf32>
    %132 = vector.shape_cast %131 : vector<8xf32> to vector<8x1xf32>
    %133 = vector.broadcast %132 : vector<8x1xf32> to vector<8x8xf32>
    %134 = arith.subf %130, %133 : vector<8x8xf32>
    %135 = math.exp %134 : vector<8x8xf32>
    %cst_42 = arith.constant dense<0.000000e+00> : vector<8xf32>
    %136 = vector.multi_reduction <add>, %135, %cst_42 [1] : vector<8x8xf32> to vector<8xf32>
    %137 = vector.shape_cast %136 : vector<8xf32> to vector<8x1xf32>
    %138 = arith.truncf %135 : vector<8x8xf32> to vector<8x8xbf16>
    %139 = arith.truncf %127 : vector<8x8xf32> to vector<8x8xbf16>
    %cst_43 = arith.constant dense<0.000000e+00> : vector<8x8xf32>
    %140 = tpu.matmul %138, %139, %cst_43 {dimension_numbers = #tpu.dot_dimension_numbers<[1], [0], [0], [1], [0, 0, 1, 1], [], []>} : vector<8x8xbf16>, vector<8x8xbf16>, vector<8x8xf32> -> vector<8x8xf32>
    %141 = tpu.reciprocal %137 {approx = true} : vector<8x1xf32> -> vector<8x1xf32>
    %142 = vector.broadcast %141 : vector<8x1xf32> to vector<8x8xf32>
    %143 = arith.mulf %140, %142 : vector<8x8xf32>
    %144 = arith.truncf %143 : vector<8x8xf32> to vector<8x8xbf16>
    %c8_44 = arith.constant 8 : index
    %c0_45 = arith.constant 0 : index
    %145 = vector.load %arg15[%c8_44, %c0_45] : memref<16x32xbf16, #tpu.memory_space<vmem>>, vector<8x8xbf16>
    tpu.vector_store %arg15[%c8_44, %c0_45], %144 {strides = array<i32>} : memref<16x32xbf16, #tpu.memory_space<vmem>>, vector<8x8xbf16>,
    %146 = vector.extract_strided_slice %30 {offsets = [8, 8], sizes = [8, 8], strides = [1, 1]} : vector<16x96xf32> to vector<8x8xf32>
    %cst_46 = arith.constant 0.353553385 : f32
    %147 = vector.broadcast %cst_46 : f32 to vector<8x8xf32>
    %148 = arith.mulf %146, %147 : vector<8x8xf32>
    %149 = vector.extract_strided_slice %30 {offsets = [8, 40], sizes = [8, 8], strides = [1, 1]} : vector<16x96xf32> to vector<8x8xf32>
    %150 = vector.extract_strided_slice %30 {offsets = [8, 72], sizes = [8, 8], strides = [1, 1]} : vector<16x96xf32> to vector<8x8xf32>
    %151 = arith.truncf %148 : vector<8x8xf32> to vector<8x8xbf16>
    %152 = arith.truncf %149 : vector<8x8xf32> to vector<8x8xbf16>
    %cst_47 = arith.constant dense<0.000000e+00> : vector<8x8xf32>
    %153 = tpu.matmul %151, %152, %cst_47 {dimension_numbers = #tpu.dot_dimension_numbers<[1], [1], [0], [0], [0, 0, 1, 0], [], []>} : vector<8x8xbf16>, vector<8x8xbf16>, vector<8x8xf32> -> vector<8x8xf32>
    %cst_48 = arith.constant dense<0xFF800000> : vector<8xf32>
    %154 = vector.multi_reduction <maximumf>, %153, %cst_48 [1] : vector<8x8xf32> to vector<8xf32>
    %155 = vector.shape_cast %154 : vector<8xf32> to vector<8x1xf32>
    %156 = vector.broadcast %155 : vector<8x1xf32> to vector<8x8xf32>
    %157 = arith.subf %153, %156 : vector<8x8xf32>
    %158 = math.exp %157 : vector<8x8xf32>
    %cst_49 = arith.constant dense<0.000000e+00> : vector<8xf32>
    %159 = vector.multi_reduction <add>, %158, %cst_49 [1] : vector<8x8xf32> to vector<8xf32>
    %160 = vector.shape_cast %159 : vector<8xf32> to vector<8x1xf32>
    %161 = arith.truncf %158 : vector<8x8xf32> to vector<8x8xbf16>
    %162 = arith.truncf %150 : vector<8x8xf32> to vector<8x8xbf16>
    %cst_50 = arith.constant dense<0.000000e+00> : vector<8x8xf32>
    %163 = tpu.matmul %161, %162, %cst_50 {dimension_numbers = #tpu.dot_dimension_numbers<[1], [0], [0], [1], [0, 0, 1, 1], [], []>} : vector<8x8xbf16>, vector<8x8xbf16>, vector<8x8xf32> -> vector<8x8xf32>
    %164 = tpu.reciprocal %160 {approx = true} : vector<8x1xf32> -> vector<8x1xf32>
    %165 = vector.broadcast %164 : vector<8x1xf32> to vector<8x8xf32>
    %166 = arith.mulf %163, %165 : vector<8x8xf32>
    %167 = arith.truncf %166 : vector<8x8xf32> to vector<8x8xbf16>
    %c8_51 = arith.constant 8 : index
    %c8_52 = arith.constant 8 : index
    %168 = vector.load %arg15[%c8_51, %c8_52] : memref<16x32xbf16, #tpu.memory_space<vmem>>, vector<8x8xbf16>
    tpu.vector_store %arg15[%c8_51, %c8_52], %167 {strides = array<i32>} : memref<16x32xbf16, #tpu.memory_space<vmem>>, vector<8x8xbf16>,
    %169 = vector.extract_strided_slice %30 {offsets = [8, 16], sizes = [8, 8], strides = [1, 1]} : vector<16x96xf32> to vector<8x8xf32>
    %cst_53 = arith.constant 0.353553385 : f32
    %170 = vector.broadcast %cst_53 : f32 to vector<8x8xf32>
    %171 = arith.mulf %169, %170 : vector<8x8xf32>
    %172 = vector.extract_strided_slice %30 {offsets = [8, 48], sizes = [8, 8], strides = [1, 1]} : vector<16x96xf32> to vector<8x8xf32>
    %173 = vector.extract_strided_slice %30 {offsets = [8, 80], sizes = [8, 8], strides = [1, 1]} : vector<16x96xf32> to vector<8x8xf32>
    %174 = arith.truncf %171 : vector<8x8xf32> to vector<8x8xbf16>
    %175 = arith.truncf %172 : vector<8x8xf32> to vector<8x8xbf16>
    %cst_54 = arith.constant dense<0.000000e+00> : vector<8x8xf32>
    %176 = tpu.matmul %174, %175, %cst_54 {dimension_numbers = #tpu.dot_dimension_numbers<[1], [1], [0], [0], [0, 0, 1, 0], [], []>} : vector<8x8xbf16>, vector<8x8xbf16>, vector<8x8xf32> -> vector<8x8xf32>
    %cst_55 = arith.constant dense<0xFF800000> : vector<8xf32>
    %177 = vector.multi_reduction <maximumf>, %176, %cst_55 [1] : vector<8x8xf32> to vector<8xf32>
    %178 = vector.shape_cast %177 : vector<8xf32> to vector<8x1xf32>
    %179 = vector.broadcast %178 : vector<8x1xf32> to vector<8x8xf32>
    %180 = arith.subf %176, %179 : vector<8x8xf32>
    %181 = math.exp %180 : vector<8x8xf32>
    %cst_56 = arith.constant dense<0.000000e+00> : vector<8xf32>
    %182 = vector.multi_reduction <add>, %181, %cst_56 [1] : vector<8x8xf32> to vector<8xf32>
    %183 = vector.shape_cast %182 : vector<8xf32> to vector<8x1xf32>
    %184 = arith.truncf %181 : vector<8x8xf32> to vector<8x8xbf16>
    %185 = arith.truncf %173 : vector<8x8xf32> to vector<8x8xbf16>
    %cst_57 = arith.constant dense<0.000000e+00> : vector<8x8xf32>
    %186 = tpu.matmul %184, %185, %cst_57 {dimension_numbers = #tpu.dot_dimension_numbers<[1], [0], [0], [1], [0, 0, 1, 1], [], []>} : vector<8x8xbf16>, vector<8x8xbf16>, vector<8x8xf32> -> vector<8x8xf32>
    %187 = tpu.reciprocal %183 {approx = true} : vector<8x1xf32> -> vector<8x1xf32>
    %188 = vector.broadcast %187 : vector<8x1xf32> to vector<8x8xf32>
    %189 = arith.mulf %186, %188 : vector<8x8xf32>
    %190 = arith.truncf %189 : vector<8x8xf32> to vector<8x8xbf16>
    %c8_58 = arith.constant 8 : index
    %c16_59 = arith.constant 16 : index
    %191 = vector.load %arg15[%c8_58, %c16_59] : memref<16x32xbf16, #tpu.memory_space<vmem>>, vector<8x8xbf16>
    tpu.vector_store %arg15[%c8_58, %c16_59], %190 {strides = array<i32>} : memref<16x32xbf16, #tpu.memory_space<vmem>>, vector<8x8xbf16>,
    %192 = vector.extract_strided_slice %30 {offsets = [8, 24], sizes = [8, 8], strides = [1, 1]} : vector<16x96xf32> to vector<8x8xf32>
    %cst_60 = arith.constant 0.353553385 : f32
    %193 = vector.broadcast %cst_60 : f32 to vector<8x8xf32>
    %194 = arith.mulf %192, %193 : vector<8x8xf32>
    %195 = vector.extract_strided_slice %30 {offsets = [8, 56], sizes = [8, 8], strides = [1, 1]} : vector<16x96xf32> to vector<8x8xf32>
    %196 = vector.extract_strided_slice %30 {offsets = [8, 88], sizes = [8, 8], strides = [1, 1]} : vector<16x96xf32> to vector<8x8xf32>
    %197 = arith.truncf %194 : vector<8x8xf32> to vector<8x8xbf16>
    %198 = arith.truncf %195 : vector<8x8xf32> to vector<8x8xbf16>
    %cst_61 = arith.constant dense<0.000000e+00> : vector<8x8xf32>
    %199 = tpu.matmul %197, %198, %cst_61 {dimension_numbers = #tpu.dot_dimension_numbers<[1], [1], [0], [0], [0, 0, 1, 0], [], []>} : vector<8x8xbf16>, vector<8x8xbf16>, vector<8x8xf32> -> vector<8x8xf32>
    %cst_62 = arith.constant dense<0xFF800000> : vector<8xf32>
    %200 = vector.multi_reduction <maximumf>, %199, %cst_62 [1] : vector<8x8xf32> to vector<8xf32>
    %201 = vector.shape_cast %200 : vector<8xf32> to vector<8x1xf32>
    %202 = vector.broadcast %201 : vector<8x1xf32> to vector<8x8xf32>
    %203 = arith.subf %199, %202 : vector<8x8xf32>
    %204 = math.exp %203 : vector<8x8xf32>
    %cst_63 = arith.constant dense<0.000000e+00> : vector<8xf32>
    %205 = vector.multi_reduction <add>, %204, %cst_63 [1] : vector<8x8xf32> to vector<8xf32>
    %206 = vector.shape_cast %205 : vector<8xf32> to vector<8x1xf32>
    %207 = arith.truncf %204 : vector<8x8xf32> to vector<8x8xbf16>
    %208 = arith.truncf %196 : vector<8x8xf32> to vector<8x8xbf16>
    %cst_64 = arith.constant dense<0.000000e+00> : vector<8x8xf32>
    %209 = tpu.matmul %207, %208, %cst_64 {dimension_numbers = #tpu.dot_dimension_numbers<[1], [0], [0], [1], [0, 0, 1, 1], [], []>} : vector<8x8xbf16>, vector<8x8xbf16>, vector<8x8xf32> -> vector<8x8xf32>
    %210 = tpu.reciprocal %206 {approx = true} : vector<8x1xf32> -> vector<8x1xf32>
    %211 = vector.broadcast %210 : vector<8x1xf32> to vector<8x8xf32>
    %212 = arith.mulf %209, %211 : vector<8x8xf32>
    %213 = arith.truncf %212 : vector<8x8xf32> to vector<8x8xbf16>
    %c8_65 = arith.constant 8 : index
    %c24_66 = arith.constant 24 : index
    %214 = vector.load %arg15[%c8_65, %c24_66] : memref<16x32xbf16, #tpu.memory_space<vmem>>, vector<8x8xbf16>
    tpu.vector_store %arg15[%c8_65, %c24_66], %213 {strides = array<i32>} : memref<16x32xbf16, #tpu.memory_space<vmem>>, vector<8x8xbf16>,
    %c0_67 = arith.constant 0 : index
    %c0_68 = arith.constant 0 : index
    %215 = vector.load %arg15[%c0_67, %c0_68] : memref<16x32xbf16, #tpu.memory_space<vmem>>, vector<16x32xbf16>
    %c0_69 = arith.constant 0 : index
    %c0_70 = arith.constant 0 : index
    %216 = vector.load %arg6[%c0_69, %c0_70] : memref<32x32xbf16, #tpu.memory_space<vmem>>, vector<32x32xbf16>
    %cst_71 = arith.constant dense<0.000000e+00> : vector<16x32xf32>
    %217 = tpu.matmul %215, %216, %cst_71 {dimension_numbers = #tpu.dot_dimension_numbers<[1], [0], [0], [1], [0, 0, 1, 1], [], []>} : vector<16x32xbf16>, vector<32x32xbf16>, vector<16x32xf32> -> vector<16x32xf32>
    %c0_72 = arith.constant 0 : index
    %c0_73 = arith.constant 0 : index
    %218 = vector.load %arg7[%c0_72, %c0_73] : memref<1x32xf32, #tpu.memory_space<vmem>>, vector<1x32xf32>
    %219 = vector.broadcast %218 : vector<1x32xf32> to vector<16x32xf32>
    %220 = arith.addf %217, %219 : vector<16x32xf32>
    %221 = arith.addf %0, %220 : vector<16x32xf32>
    %c0_74 = arith.constant 0 : index
    %c0_75 = arith.constant 0 : index
    %222 = vector.load %arg8[%c0_74, %c0_75] : memref<1x32xf32, #tpu.memory_space<vmem>>, vector<1x32xf32>
    %c0_76 = arith.constant 0 : index
    %c0_77 = arith.constant 0 : index
    %223 = vector.load %arg9[%c0_76, %c0_77] : memref<1x32xf32, #tpu.memory_space<vmem>>, vector<1x32xf32>
    %cst_78 = arith.constant dense<0.000000e+00> : vector<16xf32>
    %224 = vector.multi_reduction <add>, %221, %cst_78 [1] : vector<16x32xf32> to vector<16xf32>
    %225 = vector.shape_cast %224 : vector<16xf32> to vector<16x1xf32>
    %cst_79 = arith.constant 3.200000e+01 : f32
    %226 = vector.broadcast %cst_79 : f32 to vector<16x1xf32>
    %227 = arith.divf %225, %226 : vector<16x1xf32>
    %228 = vector.broadcast %227 : vector<16x1xf32> to vector<16x32xf32>
    %229 = arith.subf %221, %228 : vector<16x32xf32>
    %230 = arith.mulf %229, %229 : vector<16x32xf32>
    %cst_80 = arith.constant dense<0.000000e+00> : vector<16xf32>
    %231 = vector.multi_reduction <add>, %230, %cst_80 [1] : vector<16x32xf32> to vector<16xf32>
    %232 = vector.shape_cast %231 : vector<16xf32> to vector<16x1xf32>
    %cst_81 = arith.constant 3.200000e+01 : f32
    %233 = vector.broadcast %cst_81 : f32 to vector<16x1xf32>
    %234 = arith.divf %232, %233 : vector<16x1xf32>
    %235 = vector.broadcast %227 : vector<16x1xf32> to vector<16x32xf32>
    %236 = arith.subf %221, %235 : vector<16x32xf32>
    %cst_82 = arith.constant 9.99999974E-6 : f32
    %237 = vector.broadcast %cst_82 : f32 to vector<16x1xf32>
    %238 = arith.addf %234, %237 : vector<16x1xf32>
    %239 = math.rsqrt %238 : vector<16x1xf32>
    %240 = vector.broadcast %239 : vector<16x1xf32> to vector<16x32xf32>
    %241 = arith.mulf %236, %240 : vector<16x32xf32>
    %242 = vector.broadcast %222 : vector<1x32xf32> to vector<16x32xf32>
    %243 = arith.mulf %241, %242 : vector<16x32xf32>
    %244 = vector.broadcast %223 : vector<1x32xf32> to vector<16x32xf32>
    %245 = arith.addf %243, %244 : vector<16x32xf32>
    %246 = arith.truncf %245 : vector<16x32xf32> to vector<16x32xbf16>
    %c0_83 = arith.constant 0 : index
    %c0_84 = arith.constant 0 : index
    %247 = vector.load %arg10[%c0_83, %c0_84] : memref<32x64xbf16, #tpu.memory_space<vmem>>, vector<32x64xbf16>
    %cst_85 = arith.constant dense<0.000000e+00> : vector<16x64xf32>
    %248 = tpu.matmul %246, %247, %cst_85 {dimension_numbers = #tpu.dot_dimension_numbers<[1], [0], [0], [1], [0, 0, 1, 1], [], []>} : vector<16x32xbf16>, vector<32x64xbf16>, vector<16x64xf32> -> vector<16x64xf32>
    %c0_86 = arith.constant 0 : index
    %c0_87 = arith.constant 0 : index
    %249 = vector.load %arg11[%c0_86, %c0_87] : memref<1x64xf32, #tpu.memory_space<vmem>>, vector<1x64xf32>
    %250 = vector.broadcast %249 : vector<1x64xf32> to vector<16x64xf32>
    %251 = arith.addf %248, %250 : vector<16x64xf32>
    %cst_88 = arith.constant 5.000000e-01 : f32
    %252 = vector.broadcast %cst_88 : f32 to vector<16x64xf32>
    %253 = arith.mulf %252, %251 : vector<16x64xf32>
    %cst_89 = arith.constant 0.707106769 : f32
    %254 = vector.broadcast %cst_89 : f32 to vector<16x64xf32>
    %255 = arith.mulf %251, %254 : vector<16x64xf32>
    %256 = math.erf %255 : vector<16x64xf32>
    %cst_90 = arith.constant 1.000000e+00 : f32
    %257 = vector.broadcast %cst_90 : f32 to vector<16x64xf32>
    %258 = arith.addf %257, %256 : vector<16x64xf32>
    %259 = arith.mulf %253, %258 : vector<16x64xf32>
    %260 = arith.truncf %259 : vector<16x64xf32> to vector<16x64xbf16>
    %c0_91 = arith.constant 0 : index
    %c0_92 = arith.constant 0 : index
    %261 = vector.load %arg12[%c0_91, %c0_92] : memref<64x32xbf16, #tpu.memory_space<vmem>>, vector<64x32xbf16>
    %cst_93 = arith.constant dense<0.000000e+00> : vector<16x32xf32>
    %262 = tpu.matmul %260, %261, %cst_93 {dimension_numbers = #tpu.dot_dimension_numbers<[1], [0], [0], [1], [0, 0, 1, 1], [], []>} : vector<16x64xbf16>, vector<64x32xbf16>, vector<16x32xf32> -> vector<16x32xf32>
    %c0_94 = arith.constant 0 : index
    %c0_95 = arith.constant 0 : index
    %263 = vector.load %arg13[%c0_94, %c0_95] : memref<1x32xf32, #tpu.memory_space<vmem>>, vector<1x32xf32>
    %264 = vector.broadcast %263 : vector<1x32xf32> to vector<16x32xf32>
    %265 = arith.addf %262, %264 : vector<16x32xf32>
    %266 = arith.addf %265, %221 : vector<16x32xf32>
    %c0_96 = arith.constant 0 : index
    %c0_97 = arith.constant 0 : index
    %267 = vector.load %arg14[%c0_96, %c0_97] : memref<16x32xf32, #tpu.memory_space<vmem>>, vector<16x32xf32>
    tpu.vector_store %arg14[%c0_96, %c0_97], %266 {strides = array<i32>} : memref<16x32xf32, #tpu.memory_space<vmem>>, vector<16x32xf32>,
    return
  }
  func.func @transform_0(%arg0: i32) -> (i32, i32) {
    %c0_i32 = arith.constant 0 : i32
    %c0_i32_0 = arith.constant 0 : i32
    return %arg0, %c0_i32 : i32, i32
  }
  func.func @transform_1(%arg0: i32) -> (i32, i32) {
    %c0_i32 = arith.constant 0 : i32
    %c0_i32_0 = arith.constant 0 : i32
    %c0_i32_1 = arith.constant 0 : i32
    return %c0_i32, %c0_i32_0 : i32, i32
  }
  func.func @transform_2(%arg0: i32) -> (i32, i32) {
    %c0_i32 = arith.constant 0 : i32
    %c0_i32_0 = arith.constant 0 : i32
    %c0_i32_1 = arith.constant 0 : i32
    return %c0_i32, %c0_i32_0 : i32, i32
  }
  func.func @transform_3(%arg0: i32) -> (i32, i32) {
    %c0_i32 = arith.constant 0 : i32
    %c0_i32_0 = arith.constant 0 : i32
    %c0_i32_1 = arith.constant 0 : i32
    return %c0_i32, %c0_i32_0 : i32, i32
  }
  func.func @transform_4(%arg0: i32) -> (i32, i32) {
    %c0_i32 = arith.constant 0 : i32
    %c0_i32_0 = arith.constant 0 : i32
    %c0_i32_1 = arith.constant 0 : i32
    return %c0_i32, %c0_i32_0 : i32, i32
  }
  func.func @transform_5(%arg0: i32) -> (i32, i32) {
    %c0_i32 = arith.constant 0 : i32
    %c0_i32_0 = arith.constant 0 : i32
    %c0_i32_1 = arith.constant 0 : i32
    return %c0_i32, %c0_i32_0 : i32, i32
  }
  func.func @transform_6(%arg0: i32) -> (i32, i32) {
    %c0_i32 = arith.constant 0 : i32
    %c0_i32_0 = arith.constant 0 : i32
    %c0_i32_1 = arith.constant 0 : i32
    return %c0_i32, %c0_i32_0 : i32, i32
  }
  func.func @transform_7(%arg0: i32) -> (i32, i32) {
    %c0_i32 = arith.constant 0 : i32
    %c0_i32_0 = arith.constant 0 : i32
    %c0_i32_1 = arith.constant 0 : i32
    return %c0_i32, %c0_i32_0 : i32, i32
  }
  func.func @transform_8(%arg0: i32) -> (i32, i32) {
    %c0_i32 = arith.constant 0 : i32
    %c0_i32_0 = arith.constant 0 : i32
    %c0_i32_1 = arith.constant 0 : i32
    return %c0_i32, %c0_i32_0 : i32, i32
  }
  func.func @transform_9(%arg0: i32) -> (i32, i32) {
    %c0_i32 = arith.constant 0 : i32
    %c0_i32_0 = arith.constant 0 : i32
    %c0_i32_1 = arith.constant 0 : i32
    return %c0_i32, %c0_i32_0 : i32, i32
  }
  func.func @transform_10(%arg0: i32) -> (i32, i32) {
    %c0_i32 = arith.constant 0 : i32
    %c0_i32_0 = arith.constant 0 : i32
    %c0_i32_1 = arith.constant 0 : i32
    return %c0_i32, %c0_i32_0 : i32, i32
  }
  func.func @transform_11(%arg0: i32) -> (i32, i32) {
    %c0_i32 = arith.constant 0 : i32
    %c0_i32_0 = arith.constant 0 : i32
    %c0_i32_1 = arith.constant 0 : i32
    return %c0_i32, %c0_i32_0 : i32, i32
  }
  func.func @transform_12(%arg0: i32) -> (i32, i32) {
    %c0_i32 = arith.constant 0 : i32
    %c0_i32_0 = arith.constant 0 : i32
    %c0_i32_1 = arith.constant 0 : i32
    return %c0_i32, %c0_i32_0 : i32, i32
  }
  func.func @transform_13(%arg0: i32) -> (i32, i32) {
    %c0_i32 = arith.constant 0 : i32
    %c0_i32_0 = arith.constant 0 : i32
    return %arg0, %c0_i32 : i32, i32
  }
}

</mosaic_0001>

<bundles_post_ra>
// kernel: tpu_custom_call.1
= control target key start
LH: loop header
LB: loop body
LE: loop exit
PB: predicated region body
PF: predicated region fallthrough
CT: control target
= control target key end

     0   :  { %18 = vsyncpa [#allocation4], 0  ;;  %s2269_s0 = inlined_call_operand.vmem [shape: f32[16,32], index: 0, kind: input, shape index: {}]   ;;  %s2270_s1 = inlined_call_operand.vmem [shape: f32[1,32], index: 1, kind: input, shape index: {}]   ;;  %s2271_s2 = inlined_call_operand.vmem [shape: f32[1,32], index: 2, kind: input, shape index: {}]   ;;  %s2272_s3 = inlined_call_operand.vmem [shape: bf16[32,96], index: 3, kind: input, shape index: {}]   ;;  %s2273_s4 = inlined_call_operand.hbm [shape: f32[1,96], index: 4, kind: input, shape index: {}]   ;;  %s2274_s5 = inlined_call_operand.vmem [shape: bf16[32,32], index: 5, kind: input, shape index: {}]   ;;  %s2275_s6 = inlined_call_operand.hbm [shape: f32[1,32], index: 6, kind: input, shape index: {}]   ;;  %s2276_s7 = inlined_call_operand.hbm [shape: f32[1,32], index: 7, kind: input, shape index: {}]   ;;  %s2277_s8 = inlined_call_operand.hbm [shape: f32[1,32], index: 8, kind: input, shape index: {}]   ;;  %s2278_s9 = inlined_call_operand.vmem [shape: bf16[32,64], index: 9, kind: input, shape index: {}]   ;;  %s2279_s10 = inlined_call_operand.vmem [shape: f32[1,64], index: 10, kind: input, shape index: {}]   ;;  %s2280_s11 = inlined_call_operand.vmem [shape: bf16[64,32], index: 11, kind: input, shape index: {}]   ;;  %s2281_s12 = inlined_call_operand.vmem [shape: f32[1,32], index: 12, kind: input, shape index: {}]   ;;  %s2282_s13 = inlined_call_operand.hbm [shape: f32[16,32], index: 13, kind: output, shape index: {}]  }
   0x1   :  { %19 = vsyncpa [#allocation7], 0 }
   0x2   :  { %20 = vsyncpa [#allocation10], 0 }
   0x3   :  { %21 = vsyncpa [#allocation5], 0  ;;  %s1861_s25 = smov [#allocation6]   ;;  %s1862_s27 = smov [#allocation3]  }
   0x4   :  { %s48_s26 = sshll.u32 %s1861_s25, 4  ;;  %s36_s28 = sshll.u32 %s1862_s27, 4  ;;  %s49_s26 = int_to_ptr.vmem [resolvable:$true] %s48_s26  ;;  %s37_s28 = int_to_ptr.vmem [resolvable:$true] %s36_s28 }
   0x5   :  { %s1743_s14 = scalar_lea.hbm %s2275_s6, 16 }
   0x6   :  { %p1744_p0 = scmp.ne.s32.totalorder %s2275_s6, %s1743_s14  ;;  %p1747_p1 = scmp.lt.u32.totalorder %s1743_s14, %s2275_s6 }
   0x8   :  { %p1749_p2 = pnand %p1747_p1, %p1744_p0 }
   0xa   :  { %1752 = shalt.err (!%p1749_p2)
}
   0xb   :  { %s1753_s19 = scalar_lea.vmem %s49_s26, 16  ;;  %s1757_s20 = scalar_lea.vmem %s49_s26, 32 }
   0xc   :  { %p1754_p3 = scmp.ne.s32.totalorder %s49_s26, %s1753_s19  ;;  %p1758_p4 = scmp.lt.s32.totalorder %s49_s26, %s49_s26 }
   0xd   :  { %p1759_p5 = scmp.lt.s32.totalorder %s1757_s20, %s1753_s19 }
   0xf   :  { %p1760_p6 = por %p1759_p5, %p1758_p4 }
  0x11   :  { %p1761_p7 = pnand %p1760_p6, %p1754_p3 }
  0x13   :  { %1764 = shalt.err (!%p1761_p7)
}
  0x14   :  { %51 = dma.hbm_to_vmem [thread:$0]  %s2275_s6, 16, %s49_s26, [#allocation7]  }
  0x15   :  { %s1765_s25 = scalar_lea.hbm %s2273_s4, 16 }
  0x16   :  { %p1766_p8 = scmp.ne.s32.totalorder %s2273_s4, %s1765_s25  ;;  %p1769_p9 = scmp.lt.u32.totalorder %s1765_s25, %s2273_s4 }
  0x18   :  { %p1771_p10 = pnand %p1769_p9, %p1766_p8 }
  0x1a   :  { %1774 = shalt.err (!%p1771_p10)
}
  0x1b   :  { %s1775_s15 = scalar_lea.vmem %s37_s28, 16  ;;  %s1779_s16 = scalar_lea.vmem %s37_s28, 32 }
  0x1c   :  { %p1776_p11 = scmp.ne.s32.totalorder %s37_s28, %s1775_s15  ;;  %p1780_p12 = scmp.lt.s32.totalorder %s37_s28, %s37_s28 }
  0x1d   :  { %p1781_p13 = scmp.lt.s32.totalorder %s1779_s16, %s1775_s15 }
  0x1f   :  { %p1782_p0 = por %p1781_p13, %p1780_p12 }
  0x21   :  { %p1783_p1 = pnand %p1782_p0, %p1776_p11 }
  0x23   :  { %1786 = shalt.err (!%p1783_p1)
}
  0x24   :  { %39 = dma.hbm_to_vmem [thread:$0]  %s2273_s4, 16, %s37_s28, [#allocation4]  }
  0x25   :  { %s1863_s17 = smov [#allocation8]   ;;  %s1864_s19 = smov [#allocation9]  }
  0x26   :  { %s58_s18 = sshll.u32 %s1863_s17, 4  ;;  %s68_s20 = sshll.u32 %s1864_s19, 4  ;;  %s59_s18 = int_to_ptr.vmem [resolvable:$true] %s58_s18  ;;  %s69_s20 = int_to_ptr.vmem [resolvable:$true] %s68_s20 }
  0x27   :  { %s1787_s23 = scalar_lea.hbm %s2276_s7, 16 }
  0x28   :  { %p1788_p2 = scmp.ne.s32.totalorder %s2276_s7, %s1787_s23  ;;  %p1791_p3 = scmp.lt.u32.totalorder %s1787_s23, %s2276_s7 }
  0x2a   :  { %p1793_p4 = pnand %p1791_p3, %p1788_p2 }
  0x2c   :  { %1796 = shalt.err (!%p1793_p4)
}
  0x2d   :  { %s1797_s4 = scalar_lea.vmem %s59_s18, 16  ;;  %s1801_s28 = scalar_lea.vmem %s59_s18, 32 }
  0x2e   :  { %p1798_p5 = scmp.ne.s32.totalorder %s59_s18, %s1797_s4  ;;  %p1802_p6 = scmp.lt.s32.totalorder %s59_s18, %s59_s18 }
  0x2f   :  { %p1803_p7 = scmp.lt.s32.totalorder %s1801_s28, %s1797_s4 }
  0x31   :  { %p1804_p8 = por %p1803_p7, %p1802_p6 }
  0x33   :  { %p1805_p9 = pnand %p1804_p8, %p1798_p5 }
  0x35   :  { %1808 = shalt.err (!%p1805_p9)
}
  0x36   :  { %61 = dma.hbm_to_vmem [thread:$0]  %s2276_s7, 16, %s59_s18, [#allocation7]  }
  0x37   :  { %s1809_s6 = scalar_lea.hbm %s2277_s8, 16 }
  0x38   :  { %p1810_p10 = scmp.ne.s32.totalorder %s2277_s8, %s1809_s6  ;;  %p1813_p11 = scmp.lt.u32.totalorder %s1809_s6, %s2277_s8 }
  0x3a   :  { %p1815_p12 = pnand %p1813_p11, %p1810_p10 }
  0x3c   :  { %1818 = shalt.err (!%p1815_p12)
}
  0x3d   :  { %s1819_s22 = scalar_lea.vmem %s69_s20, 16  ;;  %s1823_s23 = scalar_lea.vmem %s69_s20, 32 }
  0x3e   :  { %p1820_p13 = scmp.ne.s32.totalorder %s69_s20, %s1819_s22  ;;  %p1824_p0 = scmp.lt.s32.totalorder %s69_s20, %s69_s20 }
  0x3f   :  { %p1825_p1 = scmp.lt.s32.totalorder %s1823_s23, %s1819_s22 }
  0x41   :  { %p1826_p2 = por %p1825_p1, %p1824_p0 }
  0x43   :  { %p1827_p3 = pnand %p1826_p2, %p1820_p13 }
  0x45   :  { %1830 = shalt.err (!%p1827_p3)
}
  0x46   :  { %71 = dma.hbm_to_vmem [thread:$0]  %s2277_s8, 16, %s69_s20, [#allocation10]  }
  0x47   :  { %1853 = dma.done.wait [#allocation4], 16  }
  0x48   :  { %1854 = vsyncadd [#allocation4], 4294967280 }
  0x49   :  { %1855 = dma.done.wait [#allocation7], 32  }
  0x4a   :  { %1856 = vsyncadd [#allocation7], 4294967264 }
  0x4b   :  { %1857 = dma.done.wait [#allocation10], 16  }
  0x4c   :  { %1858 = vsyncadd [#allocation10], 4294967280  ;;  %vm97_vm0 = vcmask 261120   ;;  %v2004_v0 = vld [vmem:[%s2269_s0] sm:$0xff]  ;;  %v2009_v1 = vld [vmem:[%s2269_s0 + $0x8] sm:$0xff]  ;;  %v1865_v15 = vmov 0.0  }
  0x4d   :  { %v98_v2 = vsel %vm97_vm0, %v2004_v0, 0.0  ;;  %v101_v3 = vsel %vm97_vm0, %v2009_v1, 0.0  ;;  %v1689_v14 = vld [vmem:[%s2272_s3] sm:$0xff]   ;;  %1535 = vmatprep.subr.bf16.mxu0 %v1865_v15  ;;  %1543 = vmatprep.subr.bf16.mxu1 %v1865_v15  ;;  %v1690_v16 = vld [vmem:[%s2272_s3 + $0x8] sm:$0xff]   ;;  %vm1866_vm1 = vmmov 0   ;;  %s1869_s15 = smov 112  }
  0x4e   :  { %99 = vadd.xlane.f32.xlu0 %v98_v2  ;;  %1536 = vmatpush3.bf16.msra.mxu0 %v1689_v14  ;;  %v1451_v25 = vld [vmem:[%s2270_s1] ss:$0 sm:$0xff]  ;;  %v1453_v34 = vld [vmem:[#allocation3] ss:$0 sm:$0xff]  ;;  %s1867_s1 = smov 88   ;;  %s1870_s16 = smov 120  }
  0x4f   :  { %1539 = vmatprep.mubr.msk.bf16.mxu0 %vm1866_vm1, %v1865_v15  ;;  %1537 = vmatprep.subr.bf16.mxu0 %v1865_v15  ;;  %v1452_v29 = vld [vmem:[%s2271_s2] ss:$0 sm:$0xff]  ;;  %s1868_s2 = smov 96   ;;  %s1871_s6 = smov 104   ;;  %vm215_vm2 = vcmask 64512   ;;  %vm277_vm3 = vcmask 1043456  }
  0x50   :  { %1545 = vmatprep.mubr.msk.bf16.mxu1 %vm1866_vm1, %v1865_v15  ;;  %s1872_s26 = smov 80   ;;  %s1873_s17 = smov 72   ;;  %vm324_vm4 = vcmask 60416   ;;  %vm794_vm5 = vcmask 64516   ;;  %vm442_vm6 = vcmask 126016   ;;  %vm559_vm7 = vcmask 191616  }
  0x51   :  { %s1874_s19 = smov 64   ;;  %s1875_s21 = smov 48   ;;  %vm676_vm8 = vcmask 257216   ;;  %vm913_vm9 = vcmask 130116   ;;  %vm1031_vm10 = vcmask 195716   ;;  %vm1149_vm11 = vcmask 261316  }
  0x52   :  { %102 = vadd.xlane.f32.xlu0 %v101_v3  ;;  %1538 = vmatpush3.bf16.msra.mxu0 %v1690_v16  ;;  %s1876_s22 = smov 56   ;;  %s1877_s23 = smov 40   ;;  %vm1383_vm12 = vcmask 523264  }
  0x53   :  { %1549 = vmatprep.subr.bf16.mxu0 %v1865_v15  ;;  %s1878_s7 = smov 8   ;;  %s1879_s18 = smov 24  }
  0x54   :  { %s1880_s24 = smov 16  }
  0xdb   :  { %v100_v4 = vpop.xlane.xlu0 %99 }
  0xdc   :  { %v105_v5 = vmul.f32 0.03125, %v100_v4 }
  0xde   :  { %v107_v6 = vsub.f32 %v2004_v0, %v105_v5 }
  0xdf   :  { %v103_v7 = vpop.xlane.xlu0 %102 }
  0xe0   :  { %v106_v8 = vmul.f32 0.03125, %v103_v7  ;;  %v109_v9 = vmul.f32 %v107_v6, %v107_v6 }
  0xe2   :  { %v108_v10 = vsub.f32 %v2009_v1, %v106_v8  ;;  %v111_v11 = vsel %vm97_vm0, %v109_v9, 0.0 }
  0xe3   :  { %112 = vadd.xlane.f32.xlu1 %v111_v11 }
  0xe4   :  { %v110_v12 = vmul.f32 %v108_v10, %v108_v10 }
  0xe6   :  { %v114_v13 = vsel %vm97_vm0, %v110_v12, 0.0 }
  0xe7   :  { %115 = vadd.xlane.f32.xlu1 %v114_v13 }
 0x170   :  { %v113_v17 = vpop.xlane.xlu1 %112 }
 0x171   :  { %v117_v18 = vmul.f32 0.03125, %v113_v17 }
 0x173   :  { %v119_v19 = vadd.f32 1e-05, %v117_v18 }
 0x174   :  { %v116_v20 = vpop.xlane.xlu1 %115 }
 0x175   :  { %1699 = vrsqrt.f32 %v119_v19  ;;  %v118_v21 = vmul.f32 0.03125, %v116_v20 }
 0x177   :  { %v120_v22 = vadd.f32 1e-05, %v118_v21 }
 0x179   :  { %1701 = vrsqrt.f32 %v120_v22 }
 0x17f   :  { %v1700_v23 = vpop.eup %1699 }
 0x180   :  { %v123_v24 = vmul.f32 %v1700_v23, %v107_v6 }
 0x182   :  { %v131_v28 = vmul.f32 %v1451_v25, %v123_v24 }
 0x183   :  { %v1702_v26 = vpop.eup %1701 }
 0x184   :  { %v124_v27 = vmul.f32 %v1702_v26, %v108_v10  ;;  %v139_v31 = vadd.f32 %v1452_v29, %v131_v28 }
 0x186   :  { %v132_v30 = vmul.f32 %v1451_v25, %v124_v27 }
 0x188   :  { %v140_v32 = vadd.f32 %v1452_v29, %v132_v30 }
 0x18a   :  { %v141_v33 = vpack.c.bf16 %v140_v32, %v139_v31 }
 0x18c   :  { %1540 = vmatmul.mubr.msk.bf16.vlgmr.msra.gmra.mrb[0].mxu0 %vm97_vm0, %v141_v33 }
 0x18d   :  { %1551 = vmatprep.mubr.msk.bf16.mxu0 %vm1866_vm1, %v1865_v15 }
 0x25f   :  { %v202_v35 = vpop.f32.mrb[0].mxu0 }
 0x260   :  { %v203_v36 = vadd.f32 %v1453_v34, %v202_v35  ;;  %v1541_v37 = vpop.f32.mrb[1].mxu0 }
 0x261   :  { %v205_v38 = vpop.f32.mrb[2].mxu0 }
 0x262   :  { %v209_v39 = vmul.f32 0.35355338, %v203_v36  ;;  %v2042_v40 = vpack.c.bf16 %v203_v36, %v203_v36  ;;  %v1542_v41 = vpop.f32.mrb[3].mxu0  ;;  %v206_v43 = vadd.f32 %v1453_v34, %v205_v38 }
 0x264   :  { %329 = vrot.lane.b32.xlu1 %v2042_v40, %s1867_s1  ;;  %213 = vrot.lane.b32.xlu0 %v2042_v40, %s1868_s2  ;;  %v210_v42 = vpack.c.bf16 %v209_v39, %v209_v39  ;;  %v2047_v44 = vpack.c.bf16 %v206_v43, %v206_v43  ;;  %v678_v45 = vmul.f32 0.35355338, %v206_v43 }
 0x266   :  { %v679_v46 = vpack.c.bf16 %v678_v45, %v678_v45 }
 0x268   :  { %444 = vrot.lane.b32.xlu0 %v210_v42, %s1869_s15  ;;  %327 = vrot.lane.b32.xlu1 %v210_v42, %s1870_s16 }
 0x26c   :  { %561 = vrot.lane.b32.xlu0 %v210_v42, %s1871_s6  ;;  %446 = vrot.lane.b32.xlu1 %v2042_v40, %s1872_s26 }
 0x270   :  { %563 = vrot.lane.b32.xlu1 %v2042_v40, %s1873_s17  ;;  %799 = vrot.lane.b32.xlu0 %v2047_v44, %s1867_s1 }
 0x274   :  { %917 = vrot.lane.b32.xlu0 %v2047_v44, %s1872_s26  ;;  %682 = vrot.lane.b32.xlu1 %v2047_v44, %s1868_s2  ;;  %s1881_s26 = smov [#allocation11]  }
 0x278   :  { %1035 = vrot.lane.b32.xlu0 %v2047_v44, %s1873_s17  ;;  %797 = vrot.lane.b32.xlu1 %v679_v46, %s1870_s16  ;;  %s1437_s17 = sshll.u32 %s1881_s26, 4  ;;  %s1438_s17 = int_to_ptr.vmem [resolvable:$true] %s1437_s17 }
 0x279   :  { %p1836_p5 = scmp.lt.s32.totalorder %s1438_s17, %s1438_s17 }
 0x27c   :  { %272 = vrot.lane.b32.xlu0 %v2042_v40, %s1874_s19  ;;  %915 = vrot.lane.b32.xlu1 %v679_v46, %s1869_s15 }
 0x280   :  { %504 = vrot.lane.b32.xlu0 %v2042_v40, %s1875_s21  ;;  %1033 = vrot.lane.b32.xlu1 %v679_v46, %s1871_s6 }
 0x284   :  { %387 = vrot.lane.b32.xlu1 %v2042_v40, %s1876_s22 }
 0x2d6   :  { %v214_v47 = vpop.permute.xlu0 %213  ;;  %v330_v49 = vpop.permute.xlu1 %329 }
 0x2d7   :  { %v220_v48 = vsel %vm215_vm2, %v214_v47, 0  ;;  %v335_v53 = vsel %vm215_vm2, %v330_v49, 0 }
 0x2d8   :  { %1544 = vmatpush3.bf16.xpose.msra.mxu1 %v220_v48 }
 0x2d9   :  { %1555 = vmatprep.subr.bf16.mxu1 %v1865_v15 }
 0x2da   :  { %v445_v50 = vpop.permute.xlu0 %444  ;;  %v328_v51 = vpop.permute.xlu1 %327 }
 0x2de   :  { %v562_v52 = vpop.permute.xlu0 %561  ;;  %v447_v55 = vpop.permute.xlu1 %446 }
 0x2df   :  { %1546 = vmatmul.mubr.msk.bf16.vlgmr.msra.gmra.mrb[0].mxu1 %vm215_vm2, %v210_v42  ;;  %v452_v57 = vsel %vm215_vm2, %v447_v55, 0 }
 0x2e0   :  { %1556 = vmatpush3.bf16.xpose.msra.mxu1 %v335_v53  ;;  %1557 = vmatprep.mubr.msk.bf16.mxu1 %vm1866_vm1, %v1865_v15 }
 0x2e1   :  { %1567 = vmatprep.subr.bf16.mxu1 %v1865_v15 }
 0x2e2   :  { %v800_v54 = vpop.permute.xlu0 %799  ;;  %v564_v59 = vpop.permute.xlu1 %563 }
 0x2e3   :  { %v569_v61 = vsel %vm215_vm2, %v564_v59, 0  ;;  %v805_v3 = vsel %vm215_vm2, %v800_v54, 0 }
 0x2e6   :  { %v918_v56 = vpop.permute.xlu0 %917  ;;  %v683_v63 = vpop.permute.xlu1 %682 }
 0x2e7   :  { %1558 = vmatmul.mubr.msk.bf16.vlgmr.msra.gmra.mrb[4].mxu1 %vm215_vm2, %v328_v51  ;;  %v688_v2 = vsel %vm215_vm2, %v683_v63, 0  ;;  %v923_v5 = vsel %vm215_vm2, %v918_v56, 0 }
 0x2e8   :  { %1568 = vmatpush3.bf16.xpose.msra.mxu1 %v452_v57  ;;  %1569 = vmatprep.mubr.msk.bf16.mxu1 %vm1866_vm1, %v1865_v15 }
 0x2e9   :  { %1579 = vmatprep.subr.bf16.mxu1 %v1865_v15 }
 0x2ea   :  { %v1036_v58 = vpop.permute.xlu0 %1035  ;;  %v798_v4 = vpop.permute.xlu1 %797 }
 0x2eb   :  { %v1041_v7 = vsel %vm215_vm2, %v1036_v58, 0 }
 0x2ee   :  { %v273_v60 = vpop.permute.xlu0 %272  ;;  %v916_v6 = vpop.permute.xlu1 %915 }
 0x2ef   :  { %v279_v62 = vsel %vm277_vm3, %v273_v60, 0  ;;  %1570 = vmatmul.mubr.msk.bf16.vlgmr.msra.gmra.mrb[8].mxu1 %vm215_vm2, %v445_v50 }
 0x2f0   :  { %1550 = vmatpush3.bf16.msra.mxu0 %v279_v62  ;;  %1580 = vmatpush3.bf16.xpose.msra.mxu1 %v569_v61 }
 0x2f1   :  { %1581 = vmatprep.mubr.msk.bf16.mxu1 %vm1866_vm1, %v1865_v15  ;;  %1591 = vmatprep.subr.bf16.mxu1 %v1865_v15 }
 0x2f2   :  { %1561 = vmatprep.subr.bf16.mxu0 %v1865_v15  ;;  %v1034_v8 = vpop.permute.xlu1 %1033  ;;  %v505_v51 = vpop.permute.xlu0 %504 }
 0x2f6   :  { %v388_v55 = vpop.permute.xlu1 %387 }
 0x2f7   :  { %1582 = vmatmul.mubr.msk.bf16.vlgmr.msra.gmra.mrb[12].mxu1 %vm215_vm2, %v562_v52  ;;  %v393_v63 = vsel %vm277_vm3, %v388_v55, 0 }
 0x2f8   :  { %1592 = vmatpush3.bf16.xpose.msra.mxu1 %v688_v2  ;;  %1593 = vmatprep.mubr.msk.bf16.mxu1 %vm1866_vm1, %v1865_v15 }
 0x2f9   :  { %1603 = vmatprep.subr.bf16.mxu1 %v1865_v15 }
 0x2ff   :  { %1594 = vmatmul.mubr.msk.bf16.vlgmr.msra.gmra.mrb[16].mxu1 %vm215_vm2, %v679_v46 }
 0x300   :  { %1604 = vmatpush3.bf16.xpose.msra.mxu1 %v805_v3  ;;  %1605 = vmatprep.mubr.msk.bf16.mxu1 %vm1866_vm1, %v1865_v15 }
 0x301   :  { %1615 = vmatprep.subr.bf16.mxu1 %v1865_v15 }
 0x307   :  { %1606 = vmatmul.mubr.msk.bf16.vlgmr.msra.gmra.mrb[20].mxu1 %vm215_vm2, %v798_v4 }
 0x308   :  { %1616 = vmatpush3.bf16.xpose.msra.mxu1 %v923_v5  ;;  %1617 = vmatprep.mubr.msk.bf16.mxu1 %vm1866_vm1, %v1865_v15 }
 0x309   :  { %1627 = vmatprep.subr.bf16.mxu1 %v1865_v15 }
 0x30f   :  { %1618 = vmatmul.mubr.msk.bf16.vlgmr.msra.gmra.mrb[24].mxu1 %vm215_vm2, %v916_v6 }
 0x310   :  { %1628 = vmatpush3.bf16.xpose.msra.mxu1 %v1041_v7  ;;  %1629 = vmatprep.mubr.msk.bf16.mxu1 %vm1866_vm1, %v1865_v15  ;;  %v510_v7 = vsel %vm277_vm3, %v505_v51, 0 }
 0x311   :  { %1639 = vmatprep.subr.bf16.mxu1 %v1865_v15 }
 0x317   :  { %1630 = vmatmul.mubr.msk.bf16.vlgmr.msra.gmra.mrb[28].mxu1 %vm215_vm2, %v1034_v8 }
 0x318   :  { %1643 = vmatprep.mubr.msk.bf16.mxu1 %vm1866_vm1, %v1865_v15 }
 0x3b2   :  { %v256_v9 = vpop.f32.mrb[0].mxu1 }
 0x3b3   :  { %v1547_v10 = vpop.f32.mrb[1].mxu1  ;;  %v262_v11 = vsel %vm215_vm2, %v256_v9, -inf }
 0x3b4   :  { %v259_v12 = vpop.f32.mrb[2].mxu1  ;;  %263 = vmax.xlane.f32.xlu0 %v262_v11 }
 0x3b5   :  { %v1548_v13 = vpop.f32.mrb[3].mxu1 }
 0x3ba   :  { %v371_v14 = vpop.f32.mrb[4].mxu1 }
 0x3bb   :  { %v1559_v16 = vpop.f32.mrb[5].mxu1  ;;  %v377_v17 = vsel %vm215_vm2, %v371_v14, -inf }
 0x3bc   :  { %v374_v18 = vpop.f32.mrb[6].mxu1  ;;  %378 = vmax.xlane.f32.xlu1 %v377_v17 }
 0x3bd   :  { %v1560_v19 = vpop.f32.mrb[7].mxu1 }
 0x3c2   :  { %v488_v20 = vpop.f32.mrb[8].mxu1 }
 0x3c3   :  { %v1571_v21 = vpop.f32.mrb[9].mxu1  ;;  %v494_v22 = vsel %vm215_vm2, %v488_v20, -inf }
 0x3c4   :  { %v491_v23 = vpop.f32.mrb[10].mxu1  ;;  %495 = vmax.xlane.f32.xlu0 %v494_v22 }
 0x3c5   :  { %v1572_v24 = vpop.f32.mrb[11].mxu1 }
 0x3ca   :  { %v2105_v25 = vpop.f32.mrb[12].mxu1 }
 0x3cb   :  { %v1583_v26 = vpop.f32.mrb[13].mxu1  ;;  %v611_v27 = vsel %vm215_vm2, %v2105_v25, -inf }
 0x3cc   :  { %v608_v28 = vpop.f32.mrb[14].mxu1  ;;  %612 = vmax.xlane.f32.xlu0 %v611_v27 }
 0x3cd   :  { %v1584_v29 = vpop.f32.mrb[15].mxu1  ;;  %740 = vrot.lane.b32.xlu1 %v2047_v44, %s1874_s19  ;;  %s1831_s19 = scalar_lea.vmem %s1438_s17, 256 }
 0x3ce   :  { %p1832_p4 = scmp.ne.s32.totalorder %s1438_s17, %s1831_s19  ;;  %p1837_p6 = scmp.lt.s32.totalorder %s1831_s19, %s1831_s19 }
 0x3d0   :  { %p1838_p7 = por %p1837_p6, %p1836_p5 }
 0x3d2   :  { %v2111_v30 = vpop.f32.mrb[16].mxu1  ;;  %p1839_p8 = pnand %p1838_p7, %p1832_p4 }
 0x3d3   :  { %v1595_v31 = vpop.f32.mrb[17].mxu1  ;;  %v730_v48 = vsel %vm215_vm2, %v2111_v30, -inf }
 0x3d4   :  { %v727_v32 = vpop.f32.mrb[18].mxu1 }
 0x3d5   :  { %v1596_v33 = vpop.f32.mrb[19].mxu1 }
 0x3da   :  { %v2113_v34 = vpop.f32.mrb[20].mxu1 }
 0x3db   :  { %v1607_v35 = vpop.f32.mrb[21].mxu1  ;;  %v847_v49 = vsel %vm215_vm2, %v2113_v34, -inf }
 0x3dc   :  { %v844_v36 = vpop.f32.mrb[22].mxu1 }
 0x3dd   :  { %v1608_v37 = vpop.f32.mrb[23].mxu1 }
 0x3e2   :  { %621 = vrot.lane.b32.xlu0 %v2042_v40, %s1877_s23  ;;  %v2116_v38 = vpop.f32.mrb[24].mxu1 }
 0x3e3   :  { %v1619_v39 = vpop.f32.mrb[25].mxu1  ;;  %v965_v40 = vsel %vm215_vm2, %v2116_v38, -inf }
 0x3e4   :  { %v962_v41 = vpop.f32.mrb[26].mxu1 }
 0x3e5   :  { %v1620_v42 = vpop.f32.mrb[27].mxu1 }
 0x3ea   :  { %v2118_v43 = vpop.f32.mrb[28].mxu1 }
 0x3eb   :  { %v1631_v45 = vpop.f32.mrb[29].mxu1  ;;  %v1083_v50 = vsel %vm215_vm2, %v2118_v43, -inf }
 0x3ec   :  { %v1080_v46 = vpop.f32.mrb[30].mxu1 }
 0x3ed   :  { %v1632_v47 = vpop.f32.mrb[31].mxu1 }
 0x3f1   :  { %731 = vmax.xlane.f32.xlu1 %v730_v48 }
 0x3f5   :  { %848 = vmax.xlane.f32.xlu1 %v847_v49 }
 0x401   :  { %966 = vmax.xlane.f32.xlu0 %v965_v40 }
 0x406   :  { %857 = vrot.lane.b32.xlu1 %v2047_v44, %s1876_s22 }
 0x417   :  { %975 = vrot.lane.b32.xlu0 %v2047_v44, %s1875_s21 }
 0x42a   :  { %1084 = vmax.xlane.f32.xlu1 %v1083_v50 }
 0x43b   :  { %1093 = vrot.lane.b32.xlu1 %v2047_v44, %s1877_s23 }
 0x441   :  { %v264_v52 = vpop.xlane.xlu0 %263 }
 0x442   :  { %v265_v53 = vsub.f32 %v256_v9, %v264_v52 }
 0x444   :  { %v266_v54 = vmul.f32 1.442695, %v265_v53 }
 0x446   :  { %1703 = vpow2.f32 %v266_v54 }
 0x449   :  { %v379_v56 = vpop.xlane.xlu1 %378 }
 0x44a   :  { %v380_v57 = vsub.f32 %v371_v14, %v379_v56 }
 0x44c   :  { %v381_v58 = vmul.f32 1.442695, %v380_v57 }
 0x44d   :  { %v741_v14 = vpop.permute.xlu1 %740 }
 0x44e   :  { %1705 = vpow2.f32 %v381_v58  ;;  %v746_v17 = vsel %vm277_vm3, %v741_v14, 0 }
 0x450   :  { %v2133_v59 = vpop.eup %1703 }
 0x451   :  { %v496_v60 = vpop.xlane.xlu0 %495  ;;  %v271_v61 = vpack.c.bf16 %v2133_v59, %v2133_v59  ;;  %v268_v41 = vsel %vm215_vm2, %v2133_v59, 0.0 }
 0x452   :  { %v497_v62 = vsub.f32 %v488_v20, %v496_v60 }
 0x453   :  { %1552 = vmatmul.mubr.msk.bf16.vlgmr.msra.gmra.mrb[4].mxu0 %vm215_vm2, %v271_v61 }
 0x454   :  { %v498_v44 = vmul.f32 1.442695, %v497_v62  ;;  %1562 = vmatpush3.bf16.msra.mxu0 %v393_v63  ;;  %1563 = vmatprep.mubr.msk.bf16.mxu0 %vm1866_vm1, %v1865_v15 }
 0x455   :  { %1573 = vmatprep.subr.bf16.mxu0 %v1865_v15 }
 0x456   :  { %1707 = vpow2.f32 %v498_v44 }
 0x458   :  { %v1706_v2 = vpop.eup %1705 }
 0x459   :  { %v613_v3 = vpop.xlane.xlu0 %612  ;;  %v383_v4 = vsel %vm215_vm2, %v1706_v2, 0.0  ;;  %v386_v5 = vpack.c.bf16 %v1706_v2, %v1706_v2 }
 0x45a   :  { %v614_v6 = vsub.f32 %v2105_v25, %v613_v3  ;;  %384 = vadd.xlane.f32.xlu0 %v383_v4 }
 0x45b   :  { %1564 = vmatmul.mubr.msk.bf16.vlgmr.msra.gmra.mrb[8].mxu0 %vm215_vm2, %v386_v5 }
 0x45c   :  { %v615_v8 = vmul.f32 1.442695, %v614_v6  ;;  %1574 = vmatpush3.bf16.msra.mxu0 %v510_v7  ;;  %1575 = vmatprep.mubr.msk.bf16.mxu0 %vm1866_vm1, %v1865_v15 }
 0x45d   :  { %1585 = vmatprep.subr.bf16.mxu0 %v1865_v15  ;;  %v622_v10 = vpop.permute.xlu0 %621 }
 0x45e   :  { %1709 = vpow2.f32 %v615_v8  ;;  %v627_v12 = vsel %vm277_vm3, %v622_v10, 0 }
 0x460   :  { %v2149_v9 = vpop.eup %1707 }
 0x461   :  { %v503_v11 = vpack.c.bf16 %v2149_v9, %v2149_v9 }
 0x463   :  { %1576 = vmatmul.mubr.msk.bf16.vlgmr.msra.gmra.mrb[12].mxu0 %vm215_vm2, %v503_v11 }
 0x464   :  { %1586 = vmatpush3.bf16.msra.mxu0 %v627_v12  ;;  %1587 = vmatprep.mubr.msk.bf16.mxu0 %vm1866_vm1, %v1865_v15 }
 0x465   :  { %1597 = vmatprep.subr.bf16.mxu0 %v1865_v15 }
 0x468   :  { %v1710_v13 = vpop.eup %1709 }
 0x469   :  { %v620_v16 = vpack.c.bf16 %v1710_v13, %v1710_v13  ;;  %v617_v39 = vsel %vm215_vm2, %v1710_v13, 0.0 }
 0x46b   :  { %1588 = vmatmul.mubr.msk.bf16.vlgmr.msra.gmra.mrb[16].mxu0 %vm215_vm2, %v620_v16 }
 0x46c   :  { %1598 = vmatpush3.bf16.msra.mxu0 %v746_v17  ;;  %1599 = vmatprep.mubr.msk.bf16.mxu0 %vm1866_vm1, %v1865_v15 }
 0x46d   :  { %1609 = vmatprep.subr.bf16.mxu0 %v1865_v15 }
 0x47e   :  { %v732_v18 = vpop.xlane.xlu1 %731 }
 0x47f   :  { %v733_v19 = vsub.f32 %v2111_v30, %v732_v18 }
 0x481   :  { %v734_v20 = vmul.f32 1.442695, %v733_v19 }
 0x482   :  { %v849_v21 = vpop.xlane.xlu1 %848 }
 0x483   :  { %1711 = vpow2.f32 %v734_v20  ;;  %v850_v22 = vsub.f32 %v2113_v34, %v849_v21 }
 0x485   :  { %v851_v23 = vmul.f32 1.442695, %v850_v22 }
 0x486   :  { %v858_v25 = vpop.permute.xlu1 %857 }
 0x487   :  { %1713 = vpow2.f32 %v851_v23  ;;  %v863_v29 = vsel %vm277_vm3, %v858_v25, 0 }
 0x48d   :  { %v1712_v24 = vpop.eup %1711 }
 0x48e   :  { %v967_v26 = vpop.xlane.xlu0 %966  ;;  %v739_v27 = vpack.c.bf16 %v1712_v24, %v1712_v24  ;;  %v736_v51 = vsel %vm215_vm2, %v1712_v24, 0.0 }
 0x48f   :  { %v968_v28 = vsub.f32 %v2116_v38, %v967_v26 }
 0x490   :  { %1600 = vmatmul.mubr.msk.bf16.vlgmr.msra.gmra.mrb[20].mxu0 %vm215_vm2, %v739_v27 }
 0x491   :  { %v1714_v31 = vpop.eup %1713  ;;  %v969_v32 = vmul.f32 1.442695, %v968_v28  ;;  %1610 = vmatpush3.bf16.msra.mxu0 %v863_v29  ;;  %1611 = vmatprep.mubr.msk.bf16.mxu0 %vm1866_vm1, %v1865_v15 }
 0x492   :  { %v853_v30 = vsel %vm215_vm2, %v1714_v31, 0.0  ;;  %1621 = vmatprep.subr.bf16.mxu0 %v1865_v15  ;;  %v976_v33 = vpop.permute.xlu0 %975  ;;  %v856_v34 = vpack.c.bf16 %v1714_v31, %v1714_v31 }
 0x493   :  { %1715 = vpow2.f32 %v969_v32  ;;  %854 = vadd.xlane.f32.xlu0 %v853_v30  ;;  %v981_v35 = vsel %vm277_vm3, %v976_v33, 0 }
 0x498   :  { %1612 = vmatmul.mubr.msk.bf16.vlgmr.msra.gmra.mrb[24].mxu0 %vm215_vm2, %v856_v34 }
 0x499   :  { %1622 = vmatpush3.bf16.msra.mxu0 %v981_v35  ;;  %1623 = vmatprep.mubr.msk.bf16.mxu0 %vm1866_vm1, %v1865_v15 }
 0x49a   :  { %1633 = vmatprep.subr.bf16.mxu0 %v1865_v15 }
 0x49d   :  { %v1716_v36 = vpop.eup %1715 }
 0x49e   :  { %v971_v37 = vsel %vm215_vm2, %v1716_v36, 0.0  ;;  %v974_v38 = vpack.c.bf16 %v1716_v36, %v1716_v36 }
 0x49f   :  { %972 = vadd.xlane.f32.xlu1 %v971_v37 }
 0x4a0   :  { %1624 = vmatmul.mubr.msk.bf16.vlgmr.msra.gmra.mrb[28].mxu0 %vm215_vm2, %v974_v38 }
 0x4a1   :  { %1635 = vmatprep.mubr.msk.bf16.mxu0 %vm1866_vm1, %v1865_v15 }
 0x4a3   :  { %618 = vadd.xlane.f32.xlu1 %v617_v39 }
 0x4a7   :  { %269 = vadd.xlane.f32.xlu1 %v268_v41 }
 0x4b7   :  { %v1085_v42 = vpop.xlane.xlu1 %1084 }
 0x4b8   :  { %v1086_v45 = vsub.f32 %v2118_v43, %v1085_v42  ;;  %v500_v43 = vsel %vm215_vm2, %v2149_v9, 0.0 }
 0x4ba   :  { %v1087_v46 = vmul.f32 1.442695, %v1086_v45 }
 0x4bb   :  { %v1094_v47 = vpop.permute.xlu1 %1093 }
 0x4bc   :  { %1717 = vpow2.f32 %v1087_v46  ;;  %v1099_v48 = vsel %vm277_vm3, %v1094_v47, 0 }
 0x4bd   :  { %1634 = vmatpush3.bf16.msra.mxu0 %v1099_v48 }
 0x4be   :  { %1647 = vmatprep.subr.bf16.mxu0 %v1865_v15 }
 0x4c6   :  { %v1718_v49 = vpop.eup %1717 }
 0x4c7   :  { %v1089_v40 = vsel %vm215_vm2, %v1718_v49, 0.0  ;;  %v1092_v50 = vpack.c.bf16 %v1718_v49, %v1718_v49 }
 0x4c8   :  { %1090 = vadd.xlane.f32.xlu0 %v1089_v40 }
 0x4c9   :  { %1636 = vmatmul.mubr.msk.bf16.vlgmr.msra.gmra.mrb[32].mxu0 %vm215_vm2, %v1092_v50 }
 0x4ca   :  { %1651 = vmatprep.mubr.msk.bf16.mxu0 %vm1866_vm1, %v1865_v15 }
 0x4cc   :  { %501 = vadd.xlane.f32.xlu0 %v500_v43 }
 0x4d0   :  { %737 = vadd.xlane.f32.xlu0 %v736_v51  ;;  %v1691_v51 = vld [vmem:[%s2274_s5] sm:$0xff]  }
 0x4d1   :  { %1640 = vmatpush3.bf16.msra.mxu1 %v1691_v51 }
 0x4d2   :  { %1641 = vmatprep.subr.bf16.mxu1 %v1865_v15 }
 0x4e7   :  { %v385_v52 = vpop.xlane.xlu0 %384 }
 0x4e8   :  { %1719 = vrcp.f32 %v385_v52  ;;  %v1692_v52 = vld [vmem:[%s2274_s5 + $0x8] sm:$0xff]  }
 0x4e9   :  { %1642 = vmatpush3.bf16.msra.mxu1 %v1692_v52 }
 0x4ea   :  { %1655 = vmatprep.subr.bf16.mxu1 %v1865_v15 }
 0x4f2   :  { %v1720_v58 = vpop.eup %1719 }
 0x520   :  { %v855_v19 = vpop.xlane.xlu0 %854 }
 0x526   :  { %v315_v53 = vpop.f32.mrb[4].mxu0 }
 0x527   :  { %v1553_v54 = vpop.f32.mrb[5].mxu0 }
 0x528   :  { %v318_v55 = vpop.f32.mrb[6].mxu0 }
 0x529   :  { %v1554_v56 = vpop.f32.mrb[7].mxu0 }
 0x52c   :  { %v973_v57 = vpop.xlane.xlu1 %972 }
 0x52e   :  { %v429_v59 = vpop.f32.mrb[8].mxu0 }
 0x52f   :  { %v436_v60 = vmul.f32 %v1720_v58, %v429_v59  ;;  %v1565_v61 = vpop.f32.mrb[9].mxu0 }
 0x530   :  { %v619_v62 = vpop.xlane.xlu1 %618  ;;  %v432_v63 = vpop.f32.mrb[10].mxu0 }
 0x531   :  { %v437_v44 = vpack.c.bf16 %v436_v60, %v436_v60  ;;  %v1566_v2 = vpop.f32.mrb[11].mxu0  ;;  %1721 = vrcp.f32 %v619_v62 }
 0x533   :  { %439 = vrot.lane.b32.xlu0 %v437_v44, %s1878_s7 }
 0x534   :  { %v270_v3 = vpop.xlane.xlu1 %269 }
 0x535   :  { %1723 = vrcp.f32 %v270_v3 }
 0x536   :  { %v546_v4 = vpop.f32.mrb[12].mxu0 }
 0x537   :  { %v1577_v5 = vpop.f32.mrb[13].mxu0 }
 0x538   :  { %v549_v6 = vpop.f32.mrb[14].mxu0  ;;  %v1473_v5 = vld [vmem:[#allocation6] ss:$0 sm:$0xff] }
 0x539   :  { %v1578_v7 = vpop.f32.mrb[15].mxu0 }
 0x53b   :  { %v1722_v8 = vpop.eup %1721 }
 0x53e   :  { %v663_v9 = vpop.f32.mrb[16].mxu0 }
 0x53f   :  { %v1724_v10 = vpop.eup %1723  ;;  %v670_v11 = vmul.f32 %v1722_v8, %v663_v9  ;;  %v1589_v12 = vpop.f32.mrb[17].mxu0 }
 0x540   :  { %v322_v13 = vmul.f32 %v1724_v10, %v315_v53  ;;  %v666_v14 = vpop.f32.mrb[18].mxu0 }
 0x541   :  { %v671_v16 = vpack.c.bf16 %v670_v11, %v670_v11  ;;  %v1590_v17 = vpop.f32.mrb[19].mxu0 }
 0x542   :  { %v323_v18 = vpack.c.bf16 %v322_v13, %v322_v13 }
 0x543   :  { %673 = vrot.lane.b32.xlu0 %v671_v16, %s1879_s18 }
 0x544   :  { %325 = vst.msk [vmem:[#allocation2] sm:$0xf] %vm324_vm4, %v323_v18 }
 0x555   :  { %v1091_v20 = vpop.xlane.xlu0 %1090 }
 0x559   :  { %v502_v21 = vpop.xlane.xlu0 %501 }
 0x55a   :  { %1725 = vrcp.f32 %v502_v21 }
 0x55d   :  { %v738_v22 = vpop.xlane.xlu0 %737 }
 0x55e   :  { %1727 = vrcp.f32 %v738_v22 }
 0x55f   :  { %1729 = vrcp.f32 %v855_v19 }
 0x560   :  { %1731 = vrcp.f32 %v973_v57 }
 0x561   :  { %1733 = vrcp.f32 %v1091_v20 }
 0x563   :  { %v782_v23 = vpop.f32.mrb[20].mxu0 }
 0x564   :  { %v1726_v24 = vpop.eup %1725  ;;  %v1601_v25 = vpop.f32.mrb[21].mxu0 }
 0x565   :  { %v785_v26 = vpop.f32.mrb[22].mxu0  ;;  %v553_v27 = vmul.f32 %v1726_v24, %v546_v4  ;;  %v1693_v25 = vld [vmem:[%s2278_s9] sm:$0xff]  }
 0x566   :  { %v1602_v28 = vpop.f32.mrb[23].mxu0  ;;  %1648 = vmatpush3.bf16.msra.mxu0 %v1693_v25  ;;  %v1694_v26 = vld [vmem:[%s2278_s9 + $0x8] sm:$0xff]  }
 0x567   :  { %v554_v29 = vpack.c.bf16 %v553_v27, %v553_v27  ;;  %1649 = vmatprep.subr.bf16.mxu0 %v1865_v15 }
 0x568   :  { %v1728_v31 = vpop.eup %1727 }
 0x569   :  { %v789_v32 = vmul.f32 %v1728_v31, %v782_v23  ;;  %556 = vrot.lane.b32.xlu1 %v554_v29, %s1880_s24  ;;  %v1730_v30 = vpop.eup %1729 }
 0x56a   :  { %v1732_v45 = vpop.eup %1731  ;;  %1650 = vmatpush3.bf16.msra.mxu0 %v1694_v26 }
 0x56b   :  { %v790_v33 = vpack.c.bf16 %v789_v32, %v789_v32  ;;  %v899_v34 = vpop.f32.mrb[24].mxu0  ;;  %v1734_v53 = vpop.eup %1733 }
 0x56c   :  { %v906_v35 = vmul.f32 %v1730_v30, %v899_v34  ;;  %v1613_v36 = vpop.f32.mrb[25].mxu0 }
 0x56d   :  { %v792_v37 = vrot.slane %v790_v33, 4  ;;  %v902_v38 = vpop.f32.mrb[26].mxu0 }
 0x56e   :  { %v907_v39 = vpack.c.bf16 %v906_v35, %v906_v35  ;;  %v1614_v41 = vpop.f32.mrb[27].mxu0  ;;  %v1477_v35 = vld [vmem:[#allocation8] ss:$0 sm:$0xff] }
 0x56f   :  { %795 = vst.msk [vmem:[#allocation2] sm:$0xf0] %vm794_vm5, %v792_v37 }
 0x570   :  { %v909_v42 = vrot.slane %v907_v39, 4  ;;  %v1478_v39 = vld [vmem:[#allocation9] ss:$0 sm:$0xff] }
 0x572   :  { %910 = vrot.lane.b32.xlu1 %v909_v42, %s1878_s7 }
 0x573   :  { %v1017_v46 = vpop.f32.mrb[28].mxu0 }
 0x574   :  { %v1024_v47 = vmul.f32 %v1732_v45, %v1017_v46  ;;  %v1625_v48 = vpop.f32.mrb[29].mxu0 }
 0x575   :  { %v1020_v49 = vpop.f32.mrb[30].mxu0  ;;  %v1696_v48 = vld [vmem:[%s2280_s11 + $0x8] sm:$0xff]  }
 0x576   :  { %v1025_v40 = vpack.c.bf16 %v1024_v47, %v1024_v47  ;;  %v1626_v50 = vpop.f32.mrb[31].mxu0  ;;  %v1695_v47 = vld [vmem:[%s2280_s11] sm:$0xff]   ;;  %v1697_v49 = vld [vmem:[%s2280_s11 + $0x10] sm:$0xff]  }
 0x577   :  { %v1479_v50 = vld [vmem:[%s2279_s10] ss:$0 sm:$0xff] }
 0x578   :  { %v1027_v43 = vrot.slane %v1025_v40, 4  ;;  %v1698_v40 = vld [vmem:[%s2280_s11 + $0x18] sm:$0xff]  }
 0x57a   :  { %1028 = vrot.lane.b32.xlu1 %v1027_v43, %s1880_s24 }
 0x59c   :  { %v1135_v54 = vpop.f32.mrb[32].mxu0 }
 0x59d   :  { %v1142_v55 = vmul.f32 %v1734_v53, %v1135_v54  ;;  %v1637_v56 = vpop.f32.mrb[33].mxu0 }
 0x59e   :  { %v1138_v57 = vpop.f32.mrb[34].mxu0 }
 0x59f   :  { %v1143_v58 = vpack.c.bf16 %v1142_v55, %v1142_v55  ;;  %v1638_v59 = vpop.f32.mrb[35].mxu0 }
 0x5a1   :  { %v1145_v60 = vrot.slane %v1143_v58, 4 }
 0x5a3   :  { %1146 = vrot.lane.b32.xlu1 %v1145_v60, %s1879_s18 }
 0x5a5   :  { %v440_v61 = vpop.permute.xlu0 %439 }
 0x5a6   :  { %443 = vst.msk [vmem:[#allocation2] sm:$0xf] %vm442_vm6, %v440_v61 }
 0x5b5   :  { %v674_v63 = vpop.permute.xlu0 %673 }
 0x5db   :  { %v557_v62 = vpop.permute.xlu1 %556 }
 0x5dc   :  { %560 = vst.msk [vmem:[#allocation2] sm:$0xf] %vm559_vm7, %v557_v62 }
 0x5dd   :  { %677 = vst.msk [vmem:[#allocation2] sm:$0xf] %vm676_vm8, %v674_v63 }
 0x5e4   :  { %v911_v44 = vpop.permute.xlu1 %910 }
 0x5e5   :  { %914 = vst.msk [vmem:[#allocation2] sm:$0xf0] %vm913_vm9, %v911_v44 }
 0x5ec   :  { %v1029_v2 = vpop.permute.xlu1 %1028 }
 0x5ed   :  { %1032 = vst.msk [vmem:[#allocation2] sm:$0xf0] %vm1031_vm10, %v1029_v2 }
 0x615   :  { %v1147_v3 = vpop.permute.xlu1 %1146 }
 0x616   :  { %1150 = vst.msk [vmem:[#allocation2] sm:$0xf0] %vm1149_vm11, %v1147_v3  ;;  %v1483_v3 = vld [vmem:[%s2281_s12] ss:$0 sm:$0xff] }
 0x61d   :  { %v1151_v4 = vld [vmem:[#allocation2] sm:$0xff] }
 0x61e   :  { %1644 = vmatmul.mubr.msk.bf16.vlgmr.msra.gmra.mrb[32].mxu1 %vm97_vm0, %v1151_v4 }
 0x61f   :  { %1663 = vmatprep.mubr.msk.bf16.mxu1 %vm1866_vm1, %v1865_v15  ;;  %1656 = vmatpush3.bf16.msra.mxu1 %v1695_v47 }
 0x620   :  { %1657 = vmatprep.subr.bf16.mxu1 %v1865_v15 }
 0x623   :  { %1658 = vmatpush3.bf16.msra.mxu1 %v1696_v48 }
 0x624   :  { %1659 = vmatprep.subr.bf16.mxu1 %v1865_v15 }
 0x627   :  { %1660 = vmatpush3.bf16.msra.mxu1 %v1697_v49 }
 0x628   :  { %1661 = vmatprep.subr.bf16.mxu1 %v1865_v15 }
 0x62b   :  { %1662 = vmatpush3.bf16.msra.mxu1 %v1698_v40 }
 0x6f1   :  { %v1212_v6 = vpop.f32.mrb[32].mxu1 }
 0x6f2   :  { %v1213_v7 = vadd.f32 %v1473_v5, %v1212_v6  ;;  %v1645_v8 = vpop.f32.mrb[33].mxu1 }
 0x6f3   :  { %v1215_v9 = vpop.f32.mrb[34].mxu1 }
 0x6f4   :  { %v2210_v10 = vadd.f32 %v1213_v7, %v2004_v0  ;;  %v1216_v11 = vadd.f32 %v1473_v5, %v1215_v9  ;;  %v1646_v12 = vpop.f32.mrb[35].mxu1 }
 0x6f6   :  { %v2213_v13 = vadd.f32 %v1216_v11, %v2009_v1  ;;  %v1223_v14 = vsel %vm97_vm0, %v2210_v10, 0.0 }
 0x6f7   :  { %1224 = vadd.xlane.f32.xlu0 %v1223_v14 }
 0x6f8   :  { %v1226_v16 = vsel %vm97_vm0, %v2213_v13, 0.0 }
 0x6f9   :  { %1227 = vadd.xlane.f32.xlu1 %v1226_v16 }
 0x784   :  { %v1225_v17 = vpop.xlane.xlu0 %1224 }
 0x785   :  { %v1229_v18 = vmul.f32 0.03125, %v1225_v17 }
 0x786   :  { %v1228_v19 = vpop.xlane.xlu1 %1227 }
 0x787   :  { %v1231_v20 = vsub.f32 %v2210_v10, %v1229_v18  ;;  %v1230_v0 = vmul.f32 0.03125, %v1228_v19 }
 0x789   :  { %v1232_v21 = vsub.f32 %v2213_v13, %v1230_v0  ;;  %v1233_v22 = vmul.f32 %v1231_v20, %v1231_v20 }
 0x78b   :  { %v1235_v1 = vsel %vm97_vm0, %v1233_v22, 0.0  ;;  %v1234_v23 = vmul.f32 %v1232_v21, %v1232_v21 }
 0x78c   :  { %1236 = vadd.xlane.f32.xlu0 %v1235_v1 }
 0x78d   :  { %v1238_v24 = vsel %vm97_vm0, %v1234_v23, 0.0 }
 0x790   :  { %1239 = vadd.xlane.f32.xlu0 %v1238_v24 }
 0x819   :  { %v1237_v27 = vpop.xlane.xlu0 %1236 }
 0x81a   :  { %v1241_v28 = vmul.f32 0.03125, %v1237_v27 }
 0x81c   :  { %v1243_v29 = vadd.f32 1e-05, %v1241_v28 }
 0x81d   :  { %v1240_v31 = vpop.xlane.xlu0 %1239 }
 0x81e   :  { %1735 = vrsqrt.f32 %v1243_v29  ;;  %v1242_v32 = vmul.f32 0.03125, %v1240_v31 }
 0x820   :  { %v1244_v30 = vadd.f32 1e-05, %v1242_v32 }
 0x822   :  { %1737 = vrsqrt.f32 %v1244_v30 }
 0x828   :  { %v1736_v33 = vpop.eup %1735 }
 0x829   :  { %v1247_v34 = vmul.f32 %v1736_v33, %v1231_v20 }
 0x82b   :  { %v1255_v37 = vmul.f32 %v1477_v35, %v1247_v34 }
 0x82c   :  { %v1738_v36 = vpop.eup %1737 }
 0x82d   :  { %v1248_v38 = vmul.f32 %v1738_v36, %v1232_v21  ;;  %v1263_v42 = vadd.f32 %v1478_v39, %v1255_v37 }
 0x82f   :  { %v1256_v41 = vmul.f32 %v1477_v35, %v1248_v38 }
 0x831   :  { %v1264_v45 = vadd.f32 %v1478_v39, %v1256_v41 }
 0x833   :  { %v1265_v46 = vpack.c.bf16 %v1264_v45, %v1263_v42 }
 0x835   :  { %1652 = vmatmul.mubr.msk.bf16.vlgmr.msra.gmra.mrb[36].mxu0 %vm97_vm0, %v1265_v46 }
 0x908   :  { %v1326_v43 = vpop.f32.mrb[36].mxu0 }
 0x909   :  { %v1327_v51 = vadd.f32 %v1479_v50, %v1326_v43  ;;  %v1653_v52 = vpop.f32.mrb[37].mxu0 }
 0x90a   :  { %v1329_v53 = vpop.f32.mrb[38].mxu0 }
 0x90b   :  { %v1335_v54 = vmul.f32 0.70710677, %v1327_v51  ;;  %v1330_v55 = vadd.f32 %v1479_v50, %v1329_v53  ;;  %v1654_v56 = vpop.f32.mrb[39].mxu0  ;;  %v1333_v60 = vmul.f32 0.5, %v1327_v51 }
 0x90d   :  { %1739 = verf.f32 %v1335_v54  ;;  %v1336_v57 = vmul.f32 0.70710677, %v1330_v55  ;;  %v1334_v61 = vmul.f32 0.5, %v1330_v55 }
 0x90f   :  { %1741 = verf.f32 %v1336_v57 }
 0x917   :  { %v1740_v15 = vpop.eup %1739 }
 0x918   :  { %v1339_v58 = vadd.f32 1.0, %v1740_v15 }
 0x919   :  { %v1742_v59 = vpop.eup %1741 }
 0x91a   :  { %v1340_v62 = vadd.f32 1.0, %v1742_v59  ;;  %v1341_v63 = vmul.f32 %v1339_v58, %v1333_v60 }
 0x91c   :  { %v1342_v44 = vmul.f32 %v1340_v62, %v1334_v61 }
 0x91e   :  { %v1343_v2 = vpack.c.bf16 %v1342_v44, %v1341_v63 }
 0x920   :  { %1664 = vmatmul.mubr.msk.bf16.vlgmr.msra.gmra.mrb[36].mxu1 %vm1383_vm12, %v1343_v2 }
 0x9f3   :  { %v1421_v4 = vpop.f32.mrb[36].mxu1 }
 0x9f4   :  { %v1422_v5 = vadd.f32 %v1483_v3, %v1421_v4  ;;  %v1665_v6 = vpop.f32.mrb[37].mxu1 }
 0x9f5   :  { %v1424_v7 = vpop.f32.mrb[38].mxu1 }
 0x9f6   :  { %v1428_v8 = vadd.f32 %v1422_v5, %v2210_v10  ;;  %v1425_v9 = vadd.f32 %v1483_v3, %v1424_v7  ;;  %v1666_v11 = vpop.f32.mrb[39].mxu1 }
 0x9f8   :  { %1430 = vst.msk [vmem:[#allocation11] sm:$0xff] %vm97_vm0, %v1428_v8  ;;  %v1429_v12 = vadd.f32 %v1425_v9, %v2213_v13 }
 0x9fa   :  { %1431 = vst.msk [vmem:[#allocation11 + $0x8] sm:$0xff] %vm97_vm0, %v1429_v12 }
 0x9fb   :  { %1842 = shalt.err (!%p1839_p8)
}
 0x9fc   :  { %s1843_s22 = scalar_lea.hbm %s2282_s13, 256 }
 0x9fd   :  { %p1844_p9 = scmp.ne.s32.totalorder %s2282_s13, %s1843_s22  ;;  %p1847_p10 = scmp.lt.u32.totalorder %s1843_s22, %s2282_s13 }
 0x9ff   :  { %p1849_p11 = pnand %p1847_p10, %p1844_p9 }
 0xa01   :  { %1852 = shalt.err (!%p1849_p11)
}
 0xa02   :  { %s1882_s27 = smov 128  }
 0xa03   :  { %1443 = dma.vmem_to_hbm [thread:$0]  %s1438_s17, 256, %s2282_s13, [#allocation5], %s1882_s27, %s1882_s27, %s1878_s7  }
 0xa04   :  { %1859 = dma.done.wait [#allocation5], 256  }
 0xa05   :  { %1860 = vsyncadd [#allocation5], 4294967040 }
 0xa06   :  { %1447 = vsyncpa [#allocation4], 1 }
 0xa07   :  { %1448 = vsyncpa [#allocation7], 1 }
 0xa08   :  { %1449 = vsyncpa [#allocation10], 1 }
 0xa09   :  { %1450 = vsyncpa [#allocation5], 1 }

</bundles_post_ra>
